<compile_context>
chip_gen: v7x
topology: tpu7x:2x2x1
jax: 0.10.0
libtpu: 0.0.40
codegen_flags: <defaults>
</compile_context>

<pallas_src>
import jax
import jax.numpy as jnp
from jax.experimental import pallas as pl
from jax.experimental.pallas import tpu as pltpu

HIDDEN = 512
NUM_CLASSES = 10
OUT_PAD = 128        # pad final output dim to a full lane width for lane-dense stores
MAX_TILE_B = 256     # batch tile cap: near-full MXU occupancy, modest VMEM footprint


def _round_up(x, m):
    return ((x + m - 1) // m) * m


def _mlp_kernel(h_ref, w1_ref, b1_ref, w2_ref, b2_ref, w3_ref, b3_ref, o_ref):
    # h arrives as f32; cast to bf16 on the VPU right before the MXU (free-ish,
    # avoids a separate HBM round trip for a pre-cast copy of h).
    x0 = h_ref[...].astype(jnp.bfloat16)

    # Linear(512, 512) + ReLU
    x = jnp.dot(x0, w1_ref[...], preferred_element_type=jnp.float32)
    x = jnp.maximum(x + b1_ref[...], 0.0)

    # Linear(512, 512) + ReLU
    x = jnp.dot(x.astype(jnp.bfloat16), w2_ref[...], preferred_element_type=jnp.float32)
    x = jnp.maximum(x + b2_ref[...], 0.0)

    # Linear(512, 10) (weights padded to 128 output lanes; extra lanes are zero)
    y = jnp.dot(x.astype(jnp.bfloat16), w3_ref[...], preferred_element_type=jnp.float32)
    o_ref[...] = (y + b3_ref[...]).astype(o_ref.dtype)


def prepare_params(w1, b1, w2, b2, w3, b3):
    """One-time parameter prep (call at module init, NOT per forward):
    cast weights to bf16, keep biases f32, pad the last layer to OUT_PAD lanes."""
    w3p = jnp.zeros((HIDDEN, OUT_PAD), jnp.float32).at[:, :NUM_CLASSES].set(w3)
    b3p = jnp.zeros((1, OUT_PAD), jnp.float32).at[:, :NUM_CLASSES].set(
        b3.reshape(1, NUM_CLASSES))
    return (
        w1.astype(jnp.bfloat16),
        b1.reshape(1, HIDDEN).astype(jnp.float32),
        w2.astype(jnp.bfloat16),
        b2.reshape(1, HIDDEN).astype(jnp.float32),
        w3p.astype(jnp.bfloat16),
        b3p.astype(jnp.float32),
    )


@jax.jit
def label_predictor(h, params):
    """h: [B, 512] float32 -> logits [B, 10] float32."""
    w1, b1, w2, b2, w3p, b3p = params
    B = h.shape[0]

    # Batch tile: multiple of 8 (f32 sublane packing), capped at MAX_TILE_B.
    tile_b = min(MAX_TILE_B, _round_up(max(B, 1), 8))
    b_pad = _round_up(B, tile_b)

    hp = h
    if b_pad != B:
        # Padded rows compute bias->relu->bias chains (finite) and are sliced off below.
        hp = jnp.pad(hp, ((0, b_pad - B), (0, 0)))

    grid = (b_pad // tile_b,)

    # Weight/bias index_maps are constant, so Pallas DMAs them once and keeps them
    # resident in VMEM across grid steps (~1.2 MiB bf16 + biases); only the h tile
    # and the output tile stream per grid step.
    out = pl.pallas_call(
        _mlp_kernel,
        out_shape=jax.ShapeDtypeStruct((b_pad, OUT_PAD), jnp.float32),
        grid_spec=pltpu.PrefetchScalarGridSpec(
            num_scalar_prefetch=0,
            grid=grid,
            in_specs=[
                pl.BlockSpec((tile_b, HIDDEN), lambda i: (i, 0)),   # h tile (f32)
                pl.BlockSpec((HIDDEN, HIDDEN), lambda i: (0, 0)),   # w1 (bf16)
                pl.BlockSpec((1, HIDDEN), lambda i: (0, 0)),        # b1 (f32)
                pl.BlockSpec((HIDDEN, HIDDEN), lambda i: (0, 0)),   # w2 (bf16)
                pl.BlockSpec((1, HIDDEN), lambda i: (0, 0)),        # b2 (f32)
                pl.BlockSpec((HIDDEN, OUT_PAD), lambda i: (0, 0)),  # w3 padded (bf16)
                pl.BlockSpec((1, OUT_PAD), lambda i: (0, 0)),       # b3 padded (f32)
            ],
            out_specs=pl.BlockSpec((tile_b, OUT_PAD), lambda i: (i, 0)),
        ),
        compiler_params=pltpu.CompilerParams(
            dimension_semantics=("parallel",),   # shards grid steps across TCs on v7x
        ),
    )(hp, w1, b1, w2, b2, w3p, b3p)

    # Lane-dense padded output is produced by the kernel; slice to the module's API.
    return out[:B, :NUM_CLASSES]


def _init_linear(key, fan_in, fan_out):
    """Deterministic init mimicking PyTorch nn.Linear default (uniform +-1/sqrt(fan_in)).
    Weight is stored as [in, out] (transposed vs. torch's [out, in])."""
    kw, kb = jax.random.split(key)
    bound = 1.0 / jnp.sqrt(fan_in)
    w = jax.random.uniform(kw, (fan_in, fan_out), jnp.float32, -bound, bound)
    b = jax.random.uniform(kb, (1, fan_out), jnp.float32, -bound, bound)
    return w, b


def _ref_forward(h, w1, b1, w2, b2, w3, b3):
    """Plain-JAX reference with the same bf16-operand / f32-accumulate precision."""
    bf = jnp.bfloat16
    x = jnp.dot(h.astype(bf), w1.astype(bf), preferred_element_type=jnp.float32) + b1
    x = jnp.maximum(x, 0.0)
    x = jnp.dot(x.astype(bf), w2.astype(bf), preferred_element_type=jnp.float32) + b2
    x = jnp.maximum(x, 0.0)
    x = jnp.dot(x.astype(bf), w3.astype(bf), preferred_element_type=jnp.float32) + b3
    return x


if __name__ == "__main__":
    key = jax.random.PRNGKey(0)
    k_in, k1, k2, k3 = jax.random.split(key, 4)

    B = 32  # small demo batch; deliberately not a multiple of MAX_TILE_B
    h = jax.random.normal(k_in, (B, HIDDEN), jnp.float32)

    w1, b1 = _init_linear(k1, HIDDEN, HIDDEN)
    w2, b2 = _init_linear(k2, HIDDEN, HIDDEN)
    w3, b3 = _init_linear(k3, HIDDEN, NUM_CLASSES)

    params = prepare_params(w1, b1, w2, b2, w3, b3)

    out = label_predictor(h, params)
    out = jax.block_until_ready(out)

    ref = _ref_forward(h, w1, b1, w2, b2, w3, b3)

    assert out.shape == (B, NUM_CLASSES)
    assert jnp.all(jnp.isfinite(out))
    assert jnp.allclose(out, ref, atol=2e-2, rtol=2e-2)

    print("KERNEL_OK")
</pallas_src>

<mosaic_0001>
module attributes {stable_mosaic.version = 11 : i64} {
  func.func @_mlp_kernel(%arg0: i32, %arg1: memref<32x512xf32, #tpu.memory_space<vmem>>, %arg2: memref<512x512xbf16, #tpu.memory_space<vmem>>, %arg3: memref<1x512xf32, #tpu.memory_space<vmem>>, %arg4: memref<512x512xbf16, #tpu.memory_space<vmem>>, %arg5: memref<1x512xf32, #tpu.memory_space<vmem>>, %arg6: memref<512x128xbf16, #tpu.memory_space<vmem>>, %arg7: memref<1x128xf32, #tpu.memory_space<vmem>>, %arg8: memref<32x128xf32, #tpu.memory_space<vmem>>) attributes {dimension_semantics = [#tpu.dimension_semantics<parallel>], iteration_bounds = array<i64: 1>, scalar_prefetch = 0 : i64, scratch_operands = 0 : i64, tpu.core_type = #tpu.core_type<tc>, window_params = [{transform_indices = @transform_0, window_bounds = array<i64: 32, 512>}, {pipeline_mode = #tpu.pipeline_mode<synchronous>, transform_indices = @transform_1, window_bounds = array<i64: 512, 512>}, {pipeline_mode = #tpu.pipeline_mode<synchronous>, transform_indices = @transform_2, window_bounds = array<i64: 1, 512>}, {pipeline_mode = #tpu.pipeline_mode<synchronous>, transform_indices = @transform_3, window_bounds = array<i64: 512, 512>}, {pipeline_mode = #tpu.pipeline_mode<synchronous>, transform_indices = @transform_4, window_bounds = array<i64: 1, 512>}, {pipeline_mode = #tpu.pipeline_mode<synchronous>, transform_indices = @transform_5, window_bounds = array<i64: 512, 128>}, {pipeline_mode = #tpu.pipeline_mode<synchronous>, transform_indices = @transform_6, window_bounds = array<i64: 1, 128>}, {transform_indices = @transform_7, window_bounds = array<i64: 32, 128>}]} {
    %c0 = arith.constant 0 : index
    %c0_0 = arith.constant 0 : index
    %0 = vector.load %arg1[%c0, %c0_0] : memref<32x512xf32, #tpu.memory_space<vmem>>, vector<32x512xf32>
    %1 = arith.truncf %0 : vector<32x512xf32> to vector<32x512xbf16>
    %c0_1 = arith.constant 0 : index
    %c0_2 = arith.constant 0 : index
    %2 = vector.load %arg2[%c0_1, %c0_2] : memref<512x512xbf16, #tpu.memory_space<vmem>>, vector<512x512xbf16>
    %cst = arith.constant dense<0.000000e+00> : vector<32x512xf32>
    %3 = tpu.matmul %1, %2, %cst {dimension_numbers = #tpu.dot_dimension_numbers<[1], [0], [0], [1], [0, 0, 1, 1], [], []>} : vector<32x512xbf16>, vector<512x512xbf16>, vector<32x512xf32> -> vector<32x512xf32>
    %c0_3 = arith.constant 0 : index
    %c0_4 = arith.constant 0 : index
    %4 = vector.load %arg3[%c0_3, %c0_4] : memref<1x512xf32, #tpu.memory_space<vmem>>, vector<1x512xf32>
    %5 = vector.broadcast %4 : vector<1x512xf32> to vector<32x512xf32>
    %6 = arith.addf %3, %5 : vector<32x512xf32>
    %cst_5 = arith.constant 0.000000e+00 : f32
    %7 = vector.broadcast %cst_5 : f32 to vector<32x512xf32>
    %8 = arith.maximumf %6, %7 : vector<32x512xf32>
    %9 = arith.truncf %8 : vector<32x512xf32> to vector<32x512xbf16>
    %c0_6 = arith.constant 0 : index
    %c0_7 = arith.constant 0 : index
    %10 = vector.load %arg4[%c0_6, %c0_7] : memref<512x512xbf16, #tpu.memory_space<vmem>>, vector<512x512xbf16>
    %cst_8 = arith.constant dense<0.000000e+00> : vector<32x512xf32>
    %11 = tpu.matmul %9, %10, %cst_8 {dimension_numbers = #tpu.dot_dimension_numbers<[1], [0], [0], [1], [0, 0, 1, 1], [], []>} : vector<32x512xbf16>, vector<512x512xbf16>, vector<32x512xf32> -> vector<32x512xf32>
    %c0_9 = arith.constant 0 : index
    %c0_10 = arith.constant 0 : index
    %12 = vector.load %arg5[%c0_9, %c0_10] : memref<1x512xf32, #tpu.memory_space<vmem>>, vector<1x512xf32>
    %13 = vector.broadcast %12 : vector<1x512xf32> to vector<32x512xf32>
    %14 = arith.addf %11, %13 : vector<32x512xf32>
    %cst_11 = arith.constant 0.000000e+00 : f32
    %15 = vector.broadcast %cst_11 : f32 to vector<32x512xf32>
    %16 = arith.maximumf %14, %15 : vector<32x512xf32>
    %17 = arith.truncf %16 : vector<32x512xf32> to vector<32x512xbf16>
    %c0_12 = arith.constant 0 : index
    %c0_13 = arith.constant 0 : index
    %18 = vector.load %arg6[%c0_12, %c0_13] : memref<512x128xbf16, #tpu.memory_space<vmem>>, vector<512x128xbf16>
    %cst_14 = arith.constant dense<0.000000e+00> : vector<32x128xf32>
    %19 = tpu.matmul %17, %18, %cst_14 {dimension_numbers = #tpu.dot_dimension_numbers<[1], [0], [0], [1], [0, 0, 1, 1], [], []>} : vector<32x512xbf16>, vector<512x128xbf16>, vector<32x128xf32> -> vector<32x128xf32>
    %c0_15 = arith.constant 0 : index
    %c0_16 = arith.constant 0 : index
    %20 = vector.load %arg7[%c0_15, %c0_16] : memref<1x128xf32, #tpu.memory_space<vmem>>, vector<1x128xf32>
    %21 = vector.broadcast %20 : vector<1x128xf32> to vector<32x128xf32>
    %22 = arith.addf %19, %21 : vector<32x128xf32>
    %c0_17 = arith.constant 0 : index
    %c0_18 = arith.constant 0 : index
    %23 = vector.load %arg8[%c0_17, %c0_18] : memref<32x128xf32, #tpu.memory_space<vmem>>, vector<32x128xf32>
    tpu.vector_store %arg8[%c0_17, %c0_18], %22 {strides = array<i32>} : memref<32x128xf32, #tpu.memory_space<vmem>>, vector<32x128xf32>,
    return
  }
  func.func @transform_0(%arg0: i32) -> (i32, i32) {
    %c0_i32 = arith.constant 0 : i32
    %c0_i32_0 = arith.constant 0 : i32
    return %arg0, %c0_i32 : i32, i32
  }
  func.func @transform_1(%arg0: i32) -> (i32, i32) {
    %c0_i32 = arith.constant 0 : i32
    %c0_i32_0 = arith.constant 0 : i32
    %c0_i32_1 = arith.constant 0 : i32
    return %c0_i32, %c0_i32_0 : i32, i32
  }
  func.func @transform_2(%arg0: i32) -> (i32, i32) {
    %c0_i32 = arith.constant 0 : i32
    %c0_i32_0 = arith.constant 0 : i32
    %c0_i32_1 = arith.constant 0 : i32
    return %c0_i32, %c0_i32_0 : i32, i32
  }
  func.func @transform_3(%arg0: i32) -> (i32, i32) {
    %c0_i32 = arith.constant 0 : i32
    %c0_i32_0 = arith.constant 0 : i32
    %c0_i32_1 = arith.constant 0 : i32
    return %c0_i32, %c0_i32_0 : i32, i32
  }
  func.func @transform_4(%arg0: i32) -> (i32, i32) {
    %c0_i32 = arith.constant 0 : i32
    %c0_i32_0 = arith.constant 0 : i32
    %c0_i32_1 = arith.constant 0 : i32
    return %c0_i32, %c0_i32_0 : i32, i32
  }
  func.func @transform_5(%arg0: i32) -> (i32, i32) {
    %c0_i32 = arith.constant 0 : i32
    %c0_i32_0 = arith.constant 0 : i32
    %c0_i32_1 = arith.constant 0 : i32
    return %c0_i32, %c0_i32_0 : i32, i32
  }
  func.func @transform_6(%arg0: i32) -> (i32, i32) {
    %c0_i32 = arith.constant 0 : i32
    %c0_i32_0 = arith.constant 0 : i32
    %c0_i32_1 = arith.constant 0 : i32
    return %c0_i32, %c0_i32_0 : i32, i32
  }
  func.func @transform_7(%arg0: i32) -> (i32, i32) {
    %c0_i32 = arith.constant 0 : i32
    %c0_i32_0 = arith.constant 0 : i32
    return %arg0, %c0_i32 : i32, i32
  }
}

</mosaic_0001>

<bundles_post_ra>
// kernel: label_predictor.1
= control target key start
LH: loop header
LB: loop body
LE: loop exit
PB: predicated region body
PF: predicated region fallthrough
CT: control target
= control target key end

     0   :  { %12 = vsyncpa [#allocation3], 0  ;;  %s3625_s0 = inlined_call_operand.hbm [shape: f32[32,512], index: 0, kind: input, shape index: {}]   ;;  %s3626_s1 = inlined_call_operand.hbm [shape: bf16[512,512], index: 1, kind: input, shape index: {}]   ;;  %s3627_s2 = inlined_call_operand.vmem [shape: f32[1,512], index: 2, kind: input, shape index: {}]   ;;  %s3628_s3 = inlined_call_operand.hbm [shape: bf16[512,512], index: 3, kind: input, shape index: {}]   ;;  %s3629_s4 = inlined_call_operand.vmem [shape: f32[1,512], index: 4, kind: input, shape index: {}]   ;;  %s3630_s5 = inlined_call_operand.hbm [shape: bf16[512,128], index: 5, kind: input, shape index: {}]   ;;  %s3631_s6 = inlined_call_operand.vmem [shape: f32[1,128], index: 6, kind: input, shape index: {}]   ;;  %s3632_s7 = inlined_call_operand.vmem [shape: f32[32,128], index: 7, kind: output, shape index: {}]  }
   0x1   :  { %13 = vsyncpa [#allocation5], 0 }
   0x2   :  { %14 = vsyncpa [#allocation8], 0  ;;  %s3459_s24 = smov [#allocation4]   ;;  %s3365_s28 = scalar_lea.hbm %s3626_s1, 16384 }
   0x3   :  { %s32_s25 = sshll.u32 %s3459_s24, 4  ;;  %p3366_p0 = scmp.ne.s32.totalorder %s3626_s1, %s3365_s28  ;;  %s33_s25 = int_to_ptr.vmem [resolvable:$true] %s32_s25 }
   0x4   :  { %p3369_p1 = scmp.lt.u32.totalorder %s3365_s28, %s3626_s1 }
   0x6   :  { %p3371_p2 = pnand %p3369_p1, %p3366_p0 }
   0x8   :  { %3374 = shalt.err (!%p3371_p2)
}
   0x9   :  { %s3375_s10 = scalar_lea.vmem %s33_s25, 16384  ;;  %p3380_p4 = scmp.lt.s32.totalorder %s33_s25, %s33_s25 }
   0xa   :  { %p3376_p3 = scmp.ne.s32.totalorder %s33_s25, %s3375_s10  ;;  %p3381_p5 = scmp.lt.s32.totalorder %s3375_s10, %s3375_s10 }
   0xc   :  { %p3382_p6 = por %p3381_p5, %p3380_p4 }
   0xe   :  { %p3383_p7 = pnand %p3382_p6, %p3376_p3 }
  0x10   :  { %3386 = shalt.err (!%p3383_p7)
}
  0x11   :  { %s3460_s11 = smov 256   ;;  %s3461_s12 = smov 16  }
  0x12   :  { %38 = dma.hbm_to_vmem [thread:$0]  %s3626_s1, 16384, %s33_s25, [#allocation5], %s3460_s11, %s3460_s11, %s3461_s12  }
  0x13   :  { %s3462_s15 = smov [#allocation2]   ;;  %s3387_s19 = scalar_lea.hbm %s3625_s0, 2048 }
  0x14   :  { %s20_s16 = sshll.u32 %s3462_s15, 4  ;;  %p3388_p8 = scmp.ne.s32.totalorder %s3625_s0, %s3387_s19  ;;  %s21_s16 = int_to_ptr.vmem [resolvable:$true] %s20_s16 }
  0x15   :  { %p3391_p9 = scmp.lt.u32.totalorder %s3387_s19, %s3625_s0 }
  0x17   :  { %p3393_p10 = pnand %p3391_p9, %p3388_p8 }
  0x19   :  { %3396 = shalt.err (!%p3393_p10)
}
  0x1a   :  { %s3397_s24 = scalar_lea.vmem %s21_s16, 2048  ;;  %p3402_p12 = scmp.lt.s32.totalorder %s21_s16, %s21_s16 }
  0x1b   :  { %p3398_p11 = scmp.ne.s32.totalorder %s21_s16, %s3397_s24  ;;  %p3403_p13 = scmp.lt.s32.totalorder %s3397_s24, %s3397_s24 }
  0x1d   :  { %p3404_p0 = por %p3403_p13, %p3402_p12 }
  0x1f   :  { %p3405_p1 = pnand %p3404_p0, %p3398_p11 }
  0x21   :  { %3408 = shalt.err (!%p3405_p1)
}
  0x22   :  { %s3463_s1 = smov 512   ;;  %s3464_s25 = smov 32  }
  0x23   :  { %26 = dma.hbm_to_vmem [thread:$0]  %s3625_s0, 2048, %s21_s16, [#allocation3], %s3463_s1, %s3463_s1, %s3464_s25  }
  0x24   :  { %s3465_s28 = smov [#allocation6]   ;;  %s3466_s30 = smov [#allocation7]  }
  0x25   :  { %s46_s29 = sshll.u32 %s3465_s28, 4  ;;  %s60_s8 = sshll.u32 %s3466_s30, 4  ;;  %s47_s29 = int_to_ptr.vmem [resolvable:$true] %s46_s29  ;;  %s3536_s8 = int_to_ptr.vmem [resolvable:$true] %s60_s8 }
  0x26   :  { %s3409_s13 = scalar_lea.hbm %s3628_s3, 16384 }
  0x27   :  { %p3410_p2 = scmp.ne.s32.totalorder %s3628_s3, %s3409_s13  ;;  %p3413_p3 = scmp.lt.u32.totalorder %s3409_s13, %s3628_s3 }
  0x29   :  { %p3415_p4 = pnand %p3413_p3, %p3410_p2 }
  0x2b   :  { %3418 = shalt.err (!%p3415_p4)
}
  0x2c   :  { %s3419_s0 = scalar_lea.vmem %s47_s29, 16384  ;;  %p3424_p6 = scmp.lt.s32.totalorder %s47_s29, %s47_s29 }
  0x2d   :  { %p3420_p5 = scmp.ne.s32.totalorder %s47_s29, %s3419_s0  ;;  %p3425_p7 = scmp.lt.s32.totalorder %s3419_s0, %s3419_s0 }
  0x2f   :  { %p3426_p8 = por %p3425_p7, %p3424_p6 }
  0x31   :  { %p3427_p9 = pnand %p3426_p8, %p3420_p5 }
  0x33   :  { %3430 = shalt.err (!%p3427_p9)
}
  0x34   :  { %52 = dma.hbm_to_vmem [thread:$0]  %s3628_s3, 16384, %s47_s29, [#allocation5], %s3460_s11, %s3460_s11, %s3461_s12  }
  0x35   :  { %s3431_s22 = scalar_lea.hbm %s3630_s5, 4096 }
  0x36   :  { %p3432_p10 = scmp.ne.s32.totalorder %s3630_s5, %s3431_s22  ;;  %p3435_p11 = scmp.lt.u32.totalorder %s3431_s22, %s3630_s5 }
  0x38   :  { %p3437_p12 = pnand %p3435_p11, %p3432_p10 }
  0x3a   :  { %3440 = shalt.err (!%p3437_p12)
}
  0x3b   :  { %s3441_s26 = scalar_lea.vmem %s3536_s8, 4096  ;;  %p3446_p0 = scmp.lt.s32.totalorder %s3536_s8, %s3536_s8 }
  0x3c   :  { %p3442_p13 = scmp.ne.s32.totalorder %s3536_s8, %s3441_s26  ;;  %p3447_p1 = scmp.lt.s32.totalorder %s3441_s26, %s3441_s26 }
  0x3e   :  { %p3448_p2 = por %p3447_p1, %p3446_p0 }
  0x40   :  { %p3449_p3 = pnand %p3448_p2, %p3442_p13 }
  0x42   :  { %3452 = shalt.err (!%p3449_p3)
}
  0x43   :  { %s3467_s3 = smov 64   ;;  %s3468_s11 = smov 4  }
  0x44   :  { %66 = dma.hbm_to_vmem [thread:$0]  %s3630_s5, 4096, %s3536_s8, [#allocation8], %s3467_s3, %s3467_s3, %s3468_s11  }
  0x45   :  { %3453 = dma.done.wait [#allocation3], 2048  }
  0x46   :  { %3454 = vsyncadd [#allocation3], 4294965248 }
  0x47   :  { %3455 = dma.done.wait [#allocation5], 32768  }
  0x48   :  { %3456 = vsyncadd [#allocation5], 4294934528 }
  0x49   :  { %3457 = dma.done.wait [#allocation8], 4096  }
  0x4a   :  { %3458 = vsyncadd [#allocation8], 4294963200  ;;  %v2949_v0 = vld [vmem:[#allocation4 + $0x4] ss:$16 sps:$4 sm:$0xff]   ;;  %v2951_v1 = vld [vmem:[#allocation4 + $0xc] ss:$16 sps:$4 sm:$0xff]  }
  0x4b   :  { %896 = vmatprep.subr.bf16.mxu0 %v2949_v0  ;;  %v2953_v2 = vld [vmem:[#allocation4] ss:$16 sps:$4 sm:$0xff]   ;;  %v2954_v3 = vld [vmem:[#allocation4 + $0x8] ss:$16 sps:$4 sm:$0xff]   ;;  %1002 = vmatprep.subr.bf16.mxu1 %v2951_v1  ;;  %v2955_v4 = vld [vmem:[#allocation4 + $0x24] ss:$16 sps:$4 sm:$0xff]  }
  0x4c   :  { %897 = vmatpush1.bf16.msra.mxu0 %v2953_v2  ;;  %1003 = vmatpush1.bf16.msra.mxu1 %v2954_v3  ;;  %v2957_v5 = vld [vmem:[#allocation4 + $0x2c] ss:$16 sps:$4 sm:$0xff]   ;;  %v2959_v6 = vld [vmem:[#allocation4 + $0x20] ss:$16 sps:$4 sm:$0xff]   ;;  %v2960_v7 = vld [vmem:[#allocation4 + $0x28] ss:$16 sps:$4 sm:$0xff]  }
  0x4d   :  { %898 = vmatprep.subr.bf16.mxu0 %v2955_v4  ;;  %1004 = vmatprep.subr.bf16.mxu1 %v2957_v5  ;;  %v2961_v8 = vld [vmem:[#allocation4 + $0x44] ss:$16 sps:$4 sm:$0xff]   ;;  %v2963_v9 = vld [vmem:[#allocation4 + $0x4c] ss:$16 sps:$4 sm:$0xff]   ;;  %v2965_v10 = vld [vmem:[#allocation4 + $0x40] ss:$16 sps:$4 sm:$0xff]  }
  0x4e   :  { %v2966_v11 = vld [vmem:[#allocation4 + $0x48] ss:$16 sps:$4 sm:$0xff]   ;;  %v2967_v12 = vld [vmem:[#allocation4 + $0x64] ss:$16 sps:$4 sm:$0xff]   ;;  %v2969_v13 = vld [vmem:[#allocation4 + $0x6c] ss:$16 sps:$4 sm:$0xff]  }
  0x4f   :  { %v2971_v14 = vld [vmem:[#allocation4 + $0x60] ss:$16 sps:$4 sm:$0xff]   ;;  %v2972_v15 = vld [vmem:[#allocation4 + $0x68] ss:$16 sps:$4 sm:$0xff]   ;;  %v2973_v16 = vld [vmem:[#allocation4 + $0x84] ss:$16 sps:$4 sm:$0xff]  }
  0x50   :  { %899 = vmatpush1.bf16.msra.mxu0 %v2959_v6  ;;  %1005 = vmatpush1.bf16.msra.mxu1 %v2960_v7  ;;  %v2975_v17 = vld [vmem:[#allocation4 + $0x8c] ss:$16 sps:$4 sm:$0xff]   ;;  %v2977_v18 = vld [vmem:[#allocation4 + $0x80] ss:$16 sps:$4 sm:$0xff]   ;;  %v2978_v19 = vld [vmem:[#allocation4 + $0x88] ss:$16 sps:$4 sm:$0xff]  }
  0x51   :  { %900 = vmatprep.subr.bf16.mxu0 %v2961_v8  ;;  %1006 = vmatprep.subr.bf16.mxu1 %v2963_v9  ;;  %v2979_v20 = vld [vmem:[#allocation4 + $0xa4] ss:$16 sps:$4 sm:$0xff]   ;;  %v2981_v21 = vld [vmem:[#allocation4 + $0xac] ss:$16 sps:$4 sm:$0xff]   ;;  %v2983_v22 = vld [vmem:[#allocation4 + $0xa0] ss:$16 sps:$4 sm:$0xff]  }
  0x52   :  { %v2984_v23 = vld [vmem:[#allocation4 + $0xa8] ss:$16 sps:$4 sm:$0xff]   ;;  %v2985_v24 = vld [vmem:[#allocation4 + $0xc4] ss:$16 sps:$4 sm:$0xff]   ;;  %v2987_v25 = vld [vmem:[#allocation4 + $0xcc] ss:$16 sps:$4 sm:$0xff]  }
  0x53   :  { %v2989_v26 = vld [vmem:[#allocation4 + $0xc0] ss:$16 sps:$4 sm:$0xff]   ;;  %v2990_v27 = vld [vmem:[#allocation4 + $0xc8] ss:$16 sps:$4 sm:$0xff]   ;;  %v2991_v28 = vld [vmem:[#allocation4 + $0xe4] ss:$16 sps:$4 sm:$0xff]  }
  0x54   :  { %901 = vmatpush1.bf16.msra.mxu0 %v2965_v10  ;;  %1007 = vmatpush1.bf16.msra.mxu1 %v2966_v11  ;;  %v2993_v29 = vld [vmem:[#allocation4 + $0xec] ss:$16 sps:$4 sm:$0xff]   ;;  %v2995_v30 = vld [vmem:[#allocation4 + $0xe0] ss:$16 sps:$4 sm:$0xff]   ;;  %v2996_v31 = vld [vmem:[#allocation4 + $0xe8] ss:$16 sps:$4 sm:$0xff]  }
  0x55   :  { %902 = vmatprep.subr.bf16.mxu0 %v2967_v12  ;;  %1008 = vmatprep.subr.bf16.mxu1 %v2969_v13  ;;  %v2997_v32 = vld [vmem:[#allocation4 + $0x104] ss:$16 sps:$4 sm:$0xff]   ;;  %v2999_v33 = vld [vmem:[#allocation4 + $0x10c] ss:$16 sps:$4 sm:$0xff]   ;;  %v3001_v34 = vld [vmem:[#allocation4 + $0x100] ss:$16 sps:$4 sm:$0xff]  }
  0x56   :  { %v3002_v35 = vld [vmem:[#allocation4 + $0x108] ss:$16 sps:$4 sm:$0xff]   ;;  %v3003_v36 = vld [vmem:[#allocation4 + $0x124] ss:$16 sps:$4 sm:$0xff]   ;;  %v3005_v37 = vld [vmem:[#allocation4 + $0x12c] ss:$16 sps:$4 sm:$0xff]  }
  0x57   :  { %v3007_v38 = vld [vmem:[#allocation4 + $0x120] ss:$16 sps:$4 sm:$0xff]   ;;  %v3008_v39 = vld [vmem:[#allocation4 + $0x128] ss:$16 sps:$4 sm:$0xff]   ;;  %v3009_v40 = vld [vmem:[#allocation4 + $0x144] ss:$16 sps:$4 sm:$0xff]  }
  0x58   :  { %903 = vmatpush1.bf16.msra.mxu0 %v2971_v14  ;;  %1009 = vmatpush1.bf16.msra.mxu1 %v2972_v15  ;;  %v3011_v41 = vld [vmem:[#allocation4 + $0x14c] ss:$16 sps:$4 sm:$0xff]   ;;  %v3013_v42 = vld [vmem:[#allocation4 + $0x140] ss:$16 sps:$4 sm:$0xff]   ;;  %v3014_v43 = vld [vmem:[#allocation4 + $0x148] ss:$16 sps:$4 sm:$0xff]  }
  0x59   :  { %904 = vmatprep.subr.bf16.mxu0 %v2973_v16  ;;  %1010 = vmatprep.subr.bf16.mxu1 %v2975_v17  ;;  %v3015_v44 = vld [vmem:[#allocation4 + $0x164] ss:$16 sps:$4 sm:$0xff]   ;;  %v3017_v45 = vld [vmem:[#allocation4 + $0x16c] ss:$16 sps:$4 sm:$0xff]   ;;  %v3019_v48 = vld [vmem:[#allocation4 + $0x160] ss:$16 sps:$4 sm:$0xff]  }
  0x5a   :  { %v83_v46 = vld [vmem:[#allocation2 + $0x8] sm:$0xff]  ;;  %v3021_v51 = vld [vmem:[#allocation4 + $0x184] ss:$16 sps:$4 sm:$0xff]   ;;  %v3025_v53 = vld [vmem:[#allocation4 + $0x180] ss:$16 sps:$4 sm:$0xff]  }
  0x5b   :  { %v87_v47 = vld [vmem:[#allocation2 + $0x28] sm:$0xff]  ;;  %v3027_v55 = vld [vmem:[#allocation4 + $0x1a4] ss:$16 sps:$4 sm:$0xff]   ;;  %v3031_v57 = vld [vmem:[#allocation4 + $0x1a0] ss:$16 sps:$4 sm:$0xff]  }
  0x5c   :  { %905 = vmatpush1.bf16.msra.mxu0 %v2977_v18  ;;  %1011 = vmatpush1.bf16.msra.mxu1 %v2978_v19  ;;  %v3020_v49 = vld [vmem:[#allocation4 + $0x168] ss:$16 sps:$4 sm:$0xff]   ;;  %v99_v50 = vpack.c.bf16 %v87_v47, %v83_v46  ;;  %v3023_v52 = vld [vmem:[#allocation4 + $0x18c] ss:$16 sps:$4 sm:$0xff]   ;;  %v3033_v59 = vld [vmem:[#allocation4 + $0x1c4] ss:$16 sps:$4 sm:$0xff]  }
  0x5d   :  { %906 = vmatprep.subr.bf16.mxu0 %v2979_v20  ;;  %1012 = vmatprep.subr.bf16.mxu1 %v2981_v21  ;;  %v3026_v54 = vld [vmem:[#allocation4 + $0x188] ss:$16 sps:$4 sm:$0xff]   ;;  %v3029_v56 = vld [vmem:[#allocation4 + $0x1ac] ss:$16 sps:$4 sm:$0xff]   ;;  %v3037_v61 = vld [vmem:[#allocation4 + $0x1c0] ss:$16 sps:$4 sm:$0xff]  }
  0x5e   :  { %928 = vmatprep.mubr.bf16.mxu0 %v99_v50  ;;  %1034 = vmatprep.mubr.bf16.mxu1 %v99_v50  ;;  %v3032_v58 = vld [vmem:[#allocation4 + $0x1a8] ss:$16 sps:$4 sm:$0xff]   ;;  %v3035_v60 = vld [vmem:[#allocation4 + $0x1cc] ss:$16 sps:$4 sm:$0xff]   ;;  %v3039_v63 = vld [vmem:[#allocation4 + $0x1e4] ss:$16 sps:$4 sm:$0xff]  }
  0x5f   :  { %v3038_v62 = vld [vmem:[#allocation4 + $0x1c8] ss:$16 sps:$4 sm:$0xff]   ;;  %v3041_v0 = vld [vmem:[#allocation4 + $0x1ec] ss:$16 sps:$4 sm:$0xff]   ;;  %v3043_v1 = vld [vmem:[#allocation4 + $0x1e0] ss:$16 sps:$4 sm:$0xff]  }
  0x60   :  { %907 = vmatpush1.bf16.msra.mxu0 %v2983_v22  ;;  %1013 = vmatpush1.bf16.msra.mxu1 %v2984_v23  ;;  %v3044_v2 = vld [vmem:[#allocation4 + $0x1e8] ss:$16 sps:$4 sm:$0xff]   ;;  %v3047_v3 = vld [vmem:[#allocation4 + $0x204] ss:$16 sps:$4 sm:$0xff]   ;;  %v3050_v6 = vld [vmem:[#allocation4 + $0x20c] ss:$16 sps:$4 sm:$0xff]  }
  0x61   :  { %908 = vmatprep.subr.bf16.mxu0 %v2985_v24  ;;  %1014 = vmatprep.subr.bf16.mxu1 %v2987_v25  ;;  %v82_v4 = vld [vmem:[#allocation2] sm:$0xff]  ;;  %v3048_v8 = vld [vmem:[#allocation4 + $0x208] ss:$16 sps:$4 sm:$0xff]   ;;  %v3056_v11 = vld [vmem:[#allocation4 + $0x22c] ss:$16 sps:$4 sm:$0xff]  }
  0x62   :  { %v86_v5 = vld [vmem:[#allocation2 + $0x20] sm:$0xff]  ;;  %v3054_v13 = vld [vmem:[#allocation4 + $0x228] ss:$16 sps:$4 sm:$0xff]   ;;  %v3062_v15 = vld [vmem:[#allocation4 + $0x24c] ss:$16 sps:$4 sm:$0xff]  }
  0x63   :  { %v3045_v7 = vld [vmem:[#allocation4 + $0x200] ss:$16 sps:$4 sm:$0xff]   ;;  %v98_v9 = vpack.c.bf16 %v86_v5, %v82_v4  ;;  %v3053_v10 = vld [vmem:[#allocation4 + $0x224] ss:$16 sps:$4 sm:$0xff]   ;;  %v3060_v17 = vld [vmem:[#allocation4 + $0x248] ss:$16 sps:$4 sm:$0xff]  }
  0x64   :  { %909 = vmatpush1.bf16.msra.mxu0 %v2989_v26  ;;  %1015 = vmatpush1.bf16.msra.mxu1 %v2990_v27  ;;  %v3051_v12 = vld [vmem:[#allocation4 + $0x220] ss:$16 sps:$4 sm:$0xff]   ;;  %v3059_v14 = vld [vmem:[#allocation4 + $0x244] ss:$16 sps:$4 sm:$0xff]   ;;  %v3068_v19 = vld [vmem:[#allocation4 + $0x26c] ss:$16 sps:$4 sm:$0xff]  }
  0x65   :  { %910 = vmatprep.subr.bf16.mxu0 %v2991_v28  ;;  %1016 = vmatprep.subr.bf16.mxu1 %v2993_v29  ;;  %v3057_v16 = vld [vmem:[#allocation4 + $0x240] ss:$16 sps:$4 sm:$0xff]   ;;  %v3065_v18 = vld [vmem:[#allocation4 + $0x264] ss:$16 sps:$4 sm:$0xff]   ;;  %v3066_v21 = vld [vmem:[#allocation4 + $0x268] ss:$16 sps:$4 sm:$0xff]  }
  0x66   :  { %v3063_v20 = vld [vmem:[#allocation4 + $0x260] ss:$16 sps:$4 sm:$0xff]   ;;  %v3071_v22 = vld [vmem:[#allocation4 + $0x284] ss:$16 sps:$4 sm:$0xff]   ;;  %v3074_v23 = vld [vmem:[#allocation4 + $0x28c] ss:$16 sps:$4 sm:$0xff]  }
  0x67   :  { %v3069_v24 = vld [vmem:[#allocation4 + $0x280] ss:$16 sps:$4 sm:$0xff]   ;;  %v3072_v25 = vld [vmem:[#allocation4 + $0x288] ss:$16 sps:$4 sm:$0xff]   ;;  %v3077_v26 = vld [vmem:[#allocation4 + $0x2a4] ss:$16 sps:$4 sm:$0xff]  }
  0x68   :  { %911 = vmatpush1.bf16.msra.mxu0 %v2995_v30  ;;  %1017 = vmatpush1.bf16.msra.mxu1 %v2996_v31  ;;  %v3080_v27 = vld [vmem:[#allocation4 + $0x2ac] ss:$16 sps:$4 sm:$0xff]   ;;  %v90_v31 = vld [vmem:[#allocation2 + $0x40] sm:$0xff]  ;;  %v3090_v46 = vld [vmem:[#allocation4 + $0x2e8] ss:$16 sps:$4 sm:$0xff]  }
  0x69   :  { %912 = vmatprep.subr.bf16.mxu0 %v2997_v32  ;;  %1018 = vmatprep.subr.bf16.mxu1 %v2999_v33  ;;  %v91_v28 = vld [vmem:[#allocation2 + $0x48] sm:$0xff]  ;;  %v94_v32 = vld [vmem:[#allocation2 + $0x60] sm:$0xff] }
  0x6a   :  { %v95_v29 = vld [vmem:[#allocation2 + $0x68] sm:$0xff]  ;;  %v3075_v33 = vld [vmem:[#allocation4 + $0x2a0] ss:$16 sps:$4 sm:$0xff]   ;;  %v3095_v47 = vld [vmem:[#allocation4 + $0x304] ss:$16 sps:$4 sm:$0xff]  }
  0x6b   :  { %v103_v30 = vpack.c.bf16 %v95_v29, %v91_v28  ;;  %v3096_v50 = vld [vmem:[#allocation4 + $0x308] ss:$16 sps:$4 sm:$0xff]   ;;  %v3128_v4 = vld [vmem:[#allocation4 + $0x3ac] ss:$16 sps:$4 sm:$0xff]   ;;  %v3123_v5 = vld [vmem:[#allocation4 + $0x3a0] ss:$16 sps:$4 sm:$0xff]  }
  0x6c   :  { %913 = vmatpush1.bf16.msra.mxu0 %v3001_v34  ;;  %1019 = vmatpush1.bf16.msra.mxu1 %v3002_v35  ;;  %v3078_v34 = vld [vmem:[#allocation4 + $0x2a8] ss:$16 sps:$4 sm:$0xff]   ;;  %v102_v35 = vpack.c.bf16 %v94_v32, %v90_v31  ;;  %v96_v28 = vld [vmem:[#allocation2 + $0x70] sm:$0xff]  ;;  %v3158_v32 = vld [vmem:[#allocation6 + $0x4c] ss:$16 sps:$4 sm:$0xff]  }
  0x6d   :  { %914 = vmatprep.subr.bf16.mxu0 %v3003_v36  ;;  %1020 = vmatprep.subr.bf16.mxu1 %v3005_v37  ;;  %v3083_v36 = vld [vmem:[#allocation4 + $0x2c4] ss:$16 sps:$4 sm:$0xff]   ;;  %v3086_v37 = vld [vmem:[#allocation4 + $0x2cc] ss:$16 sps:$4 sm:$0xff]   ;;  %v3147_v29 = vld [vmem:[#allocation6 + $0x20] ss:$16 sps:$4 sm:$0xff]  }
  0x6e   :  { %v3155_v31 = vld [vmem:[#allocation6 + $0x44] ss:$16 sps:$4 sm:$0xff]  }
  0x70   :  { %915 = vmatpush1.bf16.msra.mxu0 %v3007_v38  ;;  %1021 = vmatpush1.bf16.msra.mxu1 %v3008_v39  ;;  %v3081_v38 = vld [vmem:[#allocation4 + $0x2c0] ss:$16 sps:$4 sm:$0xff]   ;;  %v3084_v39 = vld [vmem:[#allocation4 + $0x2c8] ss:$16 sps:$4 sm:$0xff]  }
  0x71   :  { %916 = vmatprep.subr.bf16.mxu0 %v3009_v40  ;;  %1022 = vmatprep.subr.bf16.mxu1 %v3011_v41  ;;  %v85_v40 = vld [vmem:[#allocation2 + $0x18] sm:$0xff] }
  0x72   :  { %v89_v41 = vld [vmem:[#allocation2 + $0x38] sm:$0xff] }
  0x74   :  { %917 = vmatpush1.bf16.msra.mxu0 %v3013_v42  ;;  %1023 = vmatpush1.bf16.msra.mxu1 %v3014_v43  ;;  %v3089_v42 = vld [vmem:[#allocation4 + $0x2e4] ss:$16 sps:$4 sm:$0xff]   ;;  %v3092_v43 = vld [vmem:[#allocation4 + $0x2ec] ss:$16 sps:$4 sm:$0xff]  }
  0x75   :  { %918 = vmatprep.subr.bf16.mxu0 %v3015_v44  ;;  %1024 = vmatprep.subr.bf16.mxu1 %v3017_v45  ;;  %v101_v44 = vpack.c.bf16 %v89_v41, %v85_v40  ;;  %v3087_v45 = vld [vmem:[#allocation4 + $0x2e0] ss:$16 sps:$4 sm:$0xff]   ;;  %v3167_v40 = vld [vmem:[#allocation6 + $0x84] ss:$16 sps:$4 sm:$0xff]   ;;  %v3170_v41 = vld [vmem:[#allocation6 + $0x8c] ss:$16 sps:$4 sm:$0xff]  }
  0x78   :  { %919 = vmatpush1.bf16.msra.mxu0 %v3019_v48  ;;  %1025 = vmatpush1.bf16.msra.mxu1 %v3020_v49  ;;  %v3098_v48 = vld [vmem:[#allocation4 + $0x30c] ss:$16 sps:$4 sm:$0xff]   ;;  %v3093_v49 = vld [vmem:[#allocation4 + $0x300] ss:$16 sps:$4 sm:$0xff]  }
  0x79   :  { %920 = vmatprep.subr.bf16.mxu0 %v3021_v51  ;;  %1026 = vmatprep.subr.bf16.mxu1 %v3023_v52  ;;  %v3101_v51 = vld [vmem:[#allocation4 + $0x324] ss:$16 sps:$4 sm:$0xff]   ;;  %v3104_v52 = vld [vmem:[#allocation4 + $0x32c] ss:$16 sps:$4 sm:$0xff]  }
  0x7c   :  { %921 = vmatpush1.bf16.msra.mxu0 %v3025_v53  ;;  %1027 = vmatpush1.bf16.msra.mxu1 %v3026_v54  ;;  %v3099_v53 = vld [vmem:[#allocation4 + $0x320] ss:$16 sps:$4 sm:$0xff]   ;;  %v3102_v54 = vld [vmem:[#allocation4 + $0x328] ss:$16 sps:$4 sm:$0xff]  }
  0x7d   :  { %922 = vmatprep.subr.bf16.mxu0 %v3027_v55  ;;  %1028 = vmatprep.subr.bf16.mxu1 %v3029_v56  ;;  %v3107_v55 = vld [vmem:[#allocation4 + $0x344] ss:$16 sps:$4 sm:$0xff]   ;;  %v3110_v56 = vld [vmem:[#allocation4 + $0x34c] ss:$16 sps:$4 sm:$0xff]  }
  0x80   :  { %923 = vmatpush1.bf16.msra.mxu0 %v3031_v57  ;;  %1029 = vmatpush1.bf16.msra.mxu1 %v3032_v58  ;;  %v3105_v57 = vld [vmem:[#allocation4 + $0x340] ss:$16 sps:$4 sm:$0xff]   ;;  %v3108_v58 = vld [vmem:[#allocation4 + $0x348] ss:$16 sps:$4 sm:$0xff]  }
  0x81   :  { %924 = vmatprep.subr.bf16.mxu0 %v3033_v59  ;;  %1030 = vmatprep.subr.bf16.mxu1 %v3035_v60  ;;  %v3113_v59 = vld [vmem:[#allocation4 + $0x364] ss:$16 sps:$4 sm:$0xff]   ;;  %v3116_v60 = vld [vmem:[#allocation4 + $0x36c] ss:$16 sps:$4 sm:$0xff]  }
  0x84   :  { %925 = vmatpush1.bf16.msra.mxu0 %v3037_v61  ;;  %1031 = vmatpush1.bf16.msra.mxu1 %v3038_v62  ;;  %v3111_v61 = vld [vmem:[#allocation4 + $0x360] ss:$16 sps:$4 sm:$0xff]   ;;  %v3114_v62 = vld [vmem:[#allocation4 + $0x368] ss:$16 sps:$4 sm:$0xff]  }
  0x85   :  { %926 = vmatprep.subr.bf16.mxu0 %v3039_v63  ;;  %1032 = vmatprep.subr.bf16.mxu1 %v3041_v0  ;;  %v3119_v63 = vld [vmem:[#allocation4 + $0x384] ss:$16 sps:$4 sm:$0xff]   ;;  %v3122_v0 = vld [vmem:[#allocation4 + $0x38c] ss:$16 sps:$4 sm:$0xff]  }
  0x88   :  { %927 = vmatpush1.bf16.msra.mxu0 %v3043_v1  ;;  %1033 = vmatpush1.bf16.msra.mxu1 %v3044_v2  ;;  %v3117_v1 = vld [vmem:[#allocation4 + $0x380] ss:$16 sps:$4 sm:$0xff]   ;;  %v3120_v2 = vld [vmem:[#allocation4 + $0x388] ss:$16 sps:$4 sm:$0xff]  }
  0x89   :  { %949 = vmatprep.subr.bf16.mxu0 %v3047_v3  ;;  %1055 = vmatprep.subr.bf16.mxu1 %v3050_v6  ;;  %v3125_v3 = vld [vmem:[#allocation4 + $0x3a4] ss:$16 sps:$4 sm:$0xff]   ;;  %v3126_v6 = vld [vmem:[#allocation4 + $0x3a8] ss:$16 sps:$4 sm:$0xff]  }
  0x8b   :  { %929 = vmatmul.mubr.bf16.vlgmr.msra.gmra.mrb[0].mxu0 %v98_v9  ;;  %1035 = vmatmul.mubr.bf16.vlgmr.msra.gmra.mrb[0].mxu1 %v98_v9  ;;  %v3129_v9 = vld [vmem:[#allocation4 + $0x3c0] ss:$16 sps:$4 sm:$0xff]  }
  0x8c   :  { %950 = vmatpush1.bf16.msra.mxu0 %v3045_v7  ;;  %1056 = vmatpush1.bf16.msra.mxu1 %v3048_v8  ;;  %v3131_v7 = vld [vmem:[#allocation4 + $0x3c4] ss:$16 sps:$4 sm:$0xff]   ;;  %v3134_v8 = vld [vmem:[#allocation4 + $0x3cc] ss:$16 sps:$4 sm:$0xff]  }
  0x8d   :  { %951 = vmatprep.subr.bf16.mxu0 %v3053_v10  ;;  %1057 = vmatprep.subr.bf16.mxu1 %v3056_v11  ;;  %v3132_v10 = vld [vmem:[#allocation4 + $0x3c8] ss:$16 sps:$4 sm:$0xff]   ;;  %v3137_v11 = vld [vmem:[#allocation4 + $0x3e4] ss:$16 sps:$4 sm:$0xff]  }
  0x8e   :  { %938 = vmatprep.mubr.bf16.mxu0 %v103_v30  ;;  %1044 = vmatprep.mubr.bf16.mxu1 %v103_v30  ;;  %v3150_v30 = vld [vmem:[#allocation6 + $0x28] ss:$16 sps:$4 sm:$0xff]  }
  0x90   :  { %952 = vmatpush1.bf16.msra.mxu0 %v3051_v12  ;;  %1058 = vmatpush1.bf16.msra.mxu1 %v3054_v13  ;;  %v3140_v12 = vld [vmem:[#allocation4 + $0x3ec] ss:$16 sps:$4 sm:$0xff]   ;;  %v3135_v13 = vld [vmem:[#allocation4 + $0x3e0] ss:$16 sps:$4 sm:$0xff]  }
  0x91   :  { %953 = vmatprep.subr.bf16.mxu0 %v3059_v14  ;;  %1059 = vmatprep.subr.bf16.mxu1 %v3062_v15  ;;  %v3138_v14 = vld [vmem:[#allocation4 + $0x3e8] ss:$16 sps:$4 sm:$0xff]   ;;  %v84_v15 = vld [vmem:[#allocation2 + $0x10] sm:$0xff] }
  0x93   :  { %939 = vmatmul.mubr.bf16.gmra.mrb[4].mxu0 %v102_v35  ;;  %1045 = vmatmul.mubr.bf16.gmra.mrb[4].mxu1 %v102_v35  ;;  %v3156_v35 = vld [vmem:[#allocation6 + $0x48] ss:$16 sps:$4 sm:$0xff]  }
  0x94   :  { %954 = vmatpush1.bf16.msra.mxu0 %v3057_v16  ;;  %1060 = vmatpush1.bf16.msra.mxu1 %v3060_v17  ;;  %v88_v16 = vld [vmem:[#allocation2 + $0x30] sm:$0xff]  ;;  %v93_v17 = vld [vmem:[#allocation2 + $0x58] sm:$0xff] }
  0x95   :  { %955 = vmatprep.subr.bf16.mxu0 %v3065_v18  ;;  %1061 = vmatprep.subr.bf16.mxu1 %v3068_v19  ;;  %v97_v18 = vld [vmem:[#allocation2 + $0x78] sm:$0xff]  ;;  %v3143_v19 = vld [vmem:[#allocation6 + $0x4] ss:$16 sps:$4 sm:$0xff]  }
  0x96   :  { %981 = vmatprep.mubr.bf16.mxu0 %v101_v44  ;;  %1087 = vmatprep.mubr.bf16.mxu1 %v101_v44  ;;  %v3173_v44 = vld [vmem:[#allocation6 + $0xa4] ss:$16 sps:$4 sm:$0xff]  }
  0x98   :  { %956 = vmatpush1.bf16.msra.mxu0 %v3063_v20  ;;  %1062 = vmatpush1.bf16.msra.mxu1 %v3066_v21  ;;  %v3146_v20 = vld [vmem:[#allocation6 + $0xc] ss:$16 sps:$4 sm:$0xff]   ;;  %v100_v21 = vpack.c.bf16 %v88_v16, %v84_v15  ;;  %v3222_v15 = vld [vmem:[#allocation6 + $0x1a8] ss:$16 sps:$4 sm:$0xff]   ;;  %v3227_v16 = vld [vmem:[#allocation6 + $0x1c4] ss:$16 sps:$4 sm:$0xff]  }
  0x99   :  { %957 = vmatprep.subr.bf16.mxu0 %v3071_v22  ;;  %1063 = vmatprep.subr.bf16.mxu1 %v3074_v23  ;;  %v3141_v22 = vld [vmem:[#allocation6] ss:$16 sps:$4 sm:$0xff]   ;;  %v3144_v23 = vld [vmem:[#allocation6 + $0x8] ss:$16 sps:$4 sm:$0xff]  }
  0x9c   :  { %958 = vmatpush1.bf16.msra.mxu0 %v3069_v24  ;;  %1064 = vmatpush1.bf16.msra.mxu1 %v3072_v25  ;;  %v105_v24 = vpack.c.bf16 %v97_v18, %v93_v17  ;;  %v3149_v25 = vld [vmem:[#allocation6 + $0x24] ss:$16 sps:$4 sm:$0xff]   ;;  %v3230_v17 = vld [vmem:[#allocation6 + $0x1cc] ss:$16 sps:$4 sm:$0xff]   ;;  %v3225_v18 = vld [vmem:[#allocation6 + $0x1c0] ss:$16 sps:$4 sm:$0xff]  }
  0x9d   :  { %959 = vmatprep.subr.bf16.mxu0 %v3077_v26  ;;  %1065 = vmatprep.subr.bf16.mxu1 %v3080_v27  ;;  %v3152_v26 = vld [vmem:[#allocation6 + $0x2c] ss:$16 sps:$4 sm:$0xff]   ;;  %v92_v27 = vld [vmem:[#allocation2 + $0x50] sm:$0xff] }
  0xa0   :  { %960 = vmatpush1.bf16.msra.mxu0 %v3075_v33  ;;  %1066 = vmatpush1.bf16.msra.mxu1 %v3078_v34  ;;  %v104_v33 = vpack.c.bf16 %v96_v28, %v92_v27  ;;  %v3153_v34 = vld [vmem:[#allocation6 + $0x40] ss:$16 sps:$4 sm:$0xff]  }
  0xa1   :  { %961 = vmatprep.subr.bf16.mxu0 %v3083_v36  ;;  %1067 = vmatprep.subr.bf16.mxu1 %v3086_v37  ;;  %v3161_v36 = vld [vmem:[#allocation6 + $0x64] ss:$16 sps:$4 sm:$0xff]   ;;  %v3164_v37 = vld [vmem:[#allocation6 + $0x6c] ss:$16 sps:$4 sm:$0xff]  }
  0xa4   :  { %962 = vmatpush1.bf16.msra.mxu0 %v3081_v38  ;;  %1068 = vmatpush1.bf16.msra.mxu1 %v3084_v39  ;;  %v3159_v38 = vld [vmem:[#allocation6 + $0x60] ss:$16 sps:$4 sm:$0xff]   ;;  %v3162_v39 = vld [vmem:[#allocation6 + $0x68] ss:$16 sps:$4 sm:$0xff]  }
  0xa5   :  { %963 = vmatprep.subr.bf16.mxu0 %v3089_v42  ;;  %1069 = vmatprep.subr.bf16.mxu1 %v3092_v43  ;;  %v3165_v42 = vld [vmem:[#allocation6 + $0x80] ss:$16 sps:$4 sm:$0xff]   ;;  %v3168_v43 = vld [vmem:[#allocation6 + $0x88] ss:$16 sps:$4 sm:$0xff]  }
  0xa8   :  { %964 = vmatpush1.bf16.msra.mxu0 %v3087_v45  ;;  %1070 = vmatpush1.bf16.msra.mxu1 %v3090_v46  ;;  %v3176_v45 = vld [vmem:[#allocation6 + $0xac] ss:$16 sps:$4 sm:$0xff]   ;;  %v3171_v46 = vld [vmem:[#allocation6 + $0xa0] ss:$16 sps:$4 sm:$0xff]  }
  0xa9   :  { %965 = vmatprep.subr.bf16.mxu0 %v3095_v47  ;;  %1071 = vmatprep.subr.bf16.mxu1 %v3098_v48  ;;  %v3174_v47 = vld [vmem:[#allocation6 + $0xa8] ss:$16 sps:$4 sm:$0xff]   ;;  %v3179_v48 = vld [vmem:[#allocation6 + $0xc4] ss:$16 sps:$4 sm:$0xff]  }
  0xac   :  { %966 = vmatpush1.bf16.msra.mxu0 %v3093_v49  ;;  %1072 = vmatpush1.bf16.msra.mxu1 %v3096_v50  ;;  %v3182_v49 = vld [vmem:[#allocation6 + $0xcc] ss:$16 sps:$4 sm:$0xff]   ;;  %v3177_v50 = vld [vmem:[#allocation6 + $0xc0] ss:$16 sps:$4 sm:$0xff]  }
  0xad   :  { %967 = vmatprep.subr.bf16.mxu0 %v3101_v51  ;;  %1073 = vmatprep.subr.bf16.mxu1 %v3104_v52  ;;  %v3180_v51 = vld [vmem:[#allocation6 + $0xc8] ss:$16 sps:$4 sm:$0xff]   ;;  %v3185_v52 = vld [vmem:[#allocation6 + $0xe4] ss:$16 sps:$4 sm:$0xff]  }
  0xb0   :  { %968 = vmatpush1.bf16.msra.mxu0 %v3099_v53  ;;  %1074 = vmatpush1.bf16.msra.mxu1 %v3102_v54  ;;  %v3188_v53 = vld [vmem:[#allocation6 + $0xec] ss:$16 sps:$4 sm:$0xff]   ;;  %v3183_v54 = vld [vmem:[#allocation6 + $0xe0] ss:$16 sps:$4 sm:$0xff]  }
  0xb1   :  { %969 = vmatprep.subr.bf16.mxu0 %v3107_v55  ;;  %1075 = vmatprep.subr.bf16.mxu1 %v3110_v56  ;;  %v3186_v55 = vld [vmem:[#allocation6 + $0xe8] ss:$16 sps:$4 sm:$0xff]   ;;  %v3191_v56 = vld [vmem:[#allocation6 + $0x104] ss:$16 sps:$4 sm:$0xff]  }
  0xb4   :  { %970 = vmatpush1.bf16.msra.mxu0 %v3105_v57  ;;  %1076 = vmatpush1.bf16.msra.mxu1 %v3108_v58  ;;  %v3194_v57 = vld [vmem:[#allocation6 + $0x10c] ss:$16 sps:$4 sm:$0xff]   ;;  %v3189_v58 = vld [vmem:[#allocation6 + $0x100] ss:$16 sps:$4 sm:$0xff]  }
  0xb5   :  { %971 = vmatprep.subr.bf16.mxu0 %v3113_v59  ;;  %1077 = vmatprep.subr.bf16.mxu1 %v3116_v60  ;;  %v3192_v59 = vld [vmem:[#allocation6 + $0x108] ss:$16 sps:$4 sm:$0xff]   ;;  %v3197_v60 = vld [vmem:[#allocation6 + $0x124] ss:$16 sps:$4 sm:$0xff]  }
  0xb8   :  { %972 = vmatpush1.bf16.msra.mxu0 %v3111_v61  ;;  %1078 = vmatpush1.bf16.msra.mxu1 %v3114_v62  ;;  %v3200_v61 = vld [vmem:[#allocation6 + $0x12c] ss:$16 sps:$4 sm:$0xff]   ;;  %v3195_v62 = vld [vmem:[#allocation6 + $0x120] ss:$16 sps:$4 sm:$0xff]  }
  0xb9   :  { %973 = vmatprep.subr.bf16.mxu0 %v3119_v63  ;;  %1079 = vmatprep.subr.bf16.mxu1 %v3122_v0  ;;  %v3198_v63 = vld [vmem:[#allocation6 + $0x128] ss:$16 sps:$4 sm:$0xff]   ;;  %v3203_v0 = vld [vmem:[#allocation6 + $0x144] ss:$16 sps:$4 sm:$0xff]  }
  0xbc   :  { %974 = vmatpush1.bf16.msra.mxu0 %v3117_v1  ;;  %1080 = vmatpush1.bf16.msra.mxu1 %v3120_v2  ;;  %v3206_v1 = vld [vmem:[#allocation6 + $0x14c] ss:$16 sps:$4 sm:$0xff]   ;;  %v3201_v2 = vld [vmem:[#allocation6 + $0x140] ss:$16 sps:$4 sm:$0xff]  }
  0xbd   :  { %975 = vmatprep.subr.bf16.mxu0 %v3125_v3  ;;  %1081 = vmatprep.subr.bf16.mxu1 %v3128_v4  ;;  %v3204_v3 = vld [vmem:[#allocation6 + $0x148] ss:$16 sps:$4 sm:$0xff]   ;;  %v3209_v4 = vld [vmem:[#allocation6 + $0x164] ss:$16 sps:$4 sm:$0xff]  }
  0xc0   :  { %976 = vmatpush1.bf16.msra.mxu0 %v3123_v5  ;;  %1082 = vmatpush1.bf16.msra.mxu1 %v3126_v6  ;;  %v3212_v5 = vld [vmem:[#allocation6 + $0x16c] ss:$16 sps:$4 sm:$0xff]   ;;  %v3207_v6 = vld [vmem:[#allocation6 + $0x160] ss:$16 sps:$4 sm:$0xff]  }
  0xc1   :  { %977 = vmatprep.subr.bf16.mxu0 %v3131_v7  ;;  %1083 = vmatprep.subr.bf16.mxu1 %v3134_v8  ;;  %v3210_v7 = vld [vmem:[#allocation6 + $0x168] ss:$16 sps:$4 sm:$0xff]   ;;  %v3215_v8 = vld [vmem:[#allocation6 + $0x184] ss:$16 sps:$4 sm:$0xff]  }
  0xc4   :  { %978 = vmatpush1.bf16.msra.mxu0 %v3129_v9  ;;  %1084 = vmatpush1.bf16.msra.mxu1 %v3132_v10  ;;  %v3218_v9 = vld [vmem:[#allocation6 + $0x18c] ss:$16 sps:$4 sm:$0xff]   ;;  %v3213_v10 = vld [vmem:[#allocation6 + $0x180] ss:$16 sps:$4 sm:$0xff]  }
  0xc5   :  { %979 = vmatprep.subr.bf16.mxu0 %v3137_v11  ;;  %1085 = vmatprep.subr.bf16.mxu1 %v3140_v12  ;;  %v3216_v11 = vld [vmem:[#allocation6 + $0x188] ss:$16 sps:$4 sm:$0xff]   ;;  %v3221_v12 = vld [vmem:[#allocation6 + $0x1a4] ss:$16 sps:$4 sm:$0xff]  }
  0xc8   :  { %980 = vmatpush1.bf16.msra.mxu0 %v3135_v13  ;;  %1086 = vmatpush1.bf16.msra.mxu1 %v3138_v14  ;;  %v3224_v13 = vld [vmem:[#allocation6 + $0x1ac] ss:$16 sps:$4 sm:$0xff]   ;;  %v3219_v14 = vld [vmem:[#allocation6 + $0x1a0] ss:$16 sps:$4 sm:$0xff]  }
  0xc9   :  { %1922 = vmatprep.subr.bf16.mxu0 %v3143_v19  ;;  %2028 = vmatprep.subr.bf16.mxu1 %v3146_v20  ;;  %v3228_v19 = vld [vmem:[#allocation6 + $0x1c8] ss:$16 sps:$4 sm:$0xff]   ;;  %v3233_v20 = vld [vmem:[#allocation6 + $0x1e4] ss:$16 sps:$4 sm:$0xff]  }
  0xcb   :  { %982 = vmatmul.mubr.bf16.vlgmr.msra.gmra.mrb[0].mxu0 %v100_v21  ;;  %1088 = vmatmul.mubr.bf16.vlgmr.msra.gmra.mrb[0].mxu1 %v100_v21  ;;  %v3236_v21 = vld [vmem:[#allocation6 + $0x1ec] ss:$16 sps:$4 sm:$0xff]  }
  0xcc   :  { %991 = vmatprep.mubr.bf16.mxu0 %v105_v24  ;;  %1097 = vmatprep.mubr.bf16.mxu1 %v105_v24  ;;  %v3239_v24 = vld [vmem:[#allocation6 + $0x204] ss:$16 sps:$4 sm:$0xff]  }
  0xcd   :  { %1923 = vmatpush1.bf16.msra.mxu0 %v3141_v22  ;;  %2029 = vmatpush1.bf16.msra.mxu1 %v3144_v23  ;;  %v3231_v22 = vld [vmem:[#allocation6 + $0x1e0] ss:$16 sps:$4 sm:$0xff]   ;;  %v3234_v23 = vld [vmem:[#allocation6 + $0x1e8] ss:$16 sps:$4 sm:$0xff]  }
  0xce   :  { %1924 = vmatprep.subr.bf16.mxu0 %v3149_v25  ;;  %2030 = vmatprep.subr.bf16.mxu1 %v3152_v26  ;;  %v3242_v25 = vld [vmem:[#allocation6 + $0x20c] ss:$16 sps:$4 sm:$0xff]   ;;  %v236_v26 = vlaneseq }
  0xd0   :  { %v3570_v27 = vshrl.u32 %v236_v26, 7 }
  0xd1   :  { %1925 = vmatpush1.bf16.msra.mxu0 %v3147_v29  ;;  %2031 = vmatpush1.bf16.msra.mxu1 %v3150_v30  ;;  %v234_v30 = vld [vmem:[%s3627_s2] sm:$0xf] }
  0xd2   :  { %1926 = vmatprep.subr.bf16.mxu0 %v3155_v31  ;;  %2032 = vmatprep.subr.bf16.mxu1 %v3158_v32  ;;  %v238_v28 = vsub.s32 0, %v3570_v27  ;;  %v246_v29 = vsub.s32 2, %v3570_v27  ;;  %v242_v31 = vsub.s32 1, %v3570_v27  ;;  %v250_v32 = vsub.s32 3, %v3570_v27 }
  0xd3   :  { %992 = vmatmul.mubr.bf16.gmra.mrb[4].mxu0 %v104_v33  ;;  %1098 = vmatmul.mubr.bf16.gmra.mrb[4].mxu1 %v104_v33 }
  0xd4   :  { %v239_v33 = vrot.slane %v234_v30, %v238_v28 }
  0xd5   :  { %1927 = vmatpush1.bf16.msra.mxu0 %v3153_v34  ;;  %2033 = vmatpush1.bf16.msra.mxu1 %v3156_v35  ;;  %v247_v34 = vrot.slane %v234_v30, %v246_v29  ;;  %v243_v35 = vrot.slane %v234_v30, %v242_v31 }
  0xd6   :  { %1928 = vmatprep.subr.bf16.mxu0 %v3161_v36  ;;  %2034 = vmatprep.subr.bf16.mxu1 %v3164_v37  ;;  %v251_v36 = vrot.slane %v234_v30, %v250_v32 }
  0xd9   :  { %1929 = vmatpush1.bf16.msra.mxu0 %v3159_v38  ;;  %2035 = vmatpush1.bf16.msra.mxu1 %v3162_v39 }
  0xda   :  { %1930 = vmatprep.subr.bf16.mxu0 %v3167_v40  ;;  %2036 = vmatprep.subr.bf16.mxu1 %v3170_v41 }
  0xdd   :  { %1931 = vmatpush1.bf16.msra.mxu0 %v3165_v42  ;;  %2037 = vmatpush1.bf16.msra.mxu1 %v3168_v43 }
  0xde   :  { %1932 = vmatprep.subr.bf16.mxu0 %v3173_v44  ;;  %2038 = vmatprep.subr.bf16.mxu1 %v3176_v45 }
  0xe1   :  { %1933 = vmatpush1.bf16.msra.mxu0 %v3171_v46  ;;  %2039 = vmatpush1.bf16.msra.mxu1 %v3174_v47 }
  0xe2   :  { %1934 = vmatprep.subr.bf16.mxu0 %v3179_v48  ;;  %2040 = vmatprep.subr.bf16.mxu1 %v3182_v49 }
  0xe5   :  { %1935 = vmatpush1.bf16.msra.mxu0 %v3177_v50  ;;  %2041 = vmatpush1.bf16.msra.mxu1 %v3180_v51 }
  0xe6   :  { %1936 = vmatprep.subr.bf16.mxu0 %v3185_v52  ;;  %2042 = vmatprep.subr.bf16.mxu1 %v3188_v53 }
  0xe9   :  { %1937 = vmatpush1.bf16.msra.mxu0 %v3183_v54  ;;  %2043 = vmatpush1.bf16.msra.mxu1 %v3186_v55 }
  0xea   :  { %1938 = vmatprep.subr.bf16.mxu0 %v3191_v56  ;;  %2044 = vmatprep.subr.bf16.mxu1 %v3194_v57 }
  0xed   :  { %1939 = vmatpush1.bf16.msra.mxu0 %v3189_v58  ;;  %2045 = vmatpush1.bf16.msra.mxu1 %v3192_v59 }
  0xee   :  { %1940 = vmatprep.subr.bf16.mxu0 %v3197_v60  ;;  %2046 = vmatprep.subr.bf16.mxu1 %v3200_v61 }
  0xf1   :  { %1941 = vmatpush1.bf16.msra.mxu0 %v3195_v62  ;;  %2047 = vmatpush1.bf16.msra.mxu1 %v3198_v63 }
  0xf2   :  { %1942 = vmatprep.subr.bf16.mxu0 %v3203_v0  ;;  %2048 = vmatprep.subr.bf16.mxu1 %v3206_v1 }
  0xf5   :  { %1943 = vmatpush1.bf16.msra.mxu0 %v3201_v2  ;;  %2049 = vmatpush1.bf16.msra.mxu1 %v3204_v3  ;;  %v3237_v2 = vld [vmem:[#allocation6 + $0x200] ss:$16 sps:$4 sm:$0xff]   ;;  %v3240_v3 = vld [vmem:[#allocation6 + $0x208] ss:$16 sps:$4 sm:$0xff]  }
  0xf6   :  { %1944 = vmatprep.subr.bf16.mxu0 %v3209_v4  ;;  %2050 = vmatprep.subr.bf16.mxu1 %v3212_v5 }
  0xf9   :  { %1945 = vmatpush1.bf16.msra.mxu0 %v3207_v6  ;;  %2051 = vmatpush1.bf16.msra.mxu1 %v3210_v7  ;;  %v3245_v7 = vld [vmem:[#allocation6 + $0x224] ss:$16 sps:$4 sm:$0xff]  }
  0xfa   :  { %1946 = vmatprep.subr.bf16.mxu0 %v3215_v8  ;;  %2052 = vmatprep.subr.bf16.mxu1 %v3218_v9  ;;  %v3248_v8 = vld [vmem:[#allocation6 + $0x22c] ss:$16 sps:$4 sm:$0xff]  }
  0xfd   :  { %1947 = vmatpush1.bf16.msra.mxu0 %v3213_v10  ;;  %2053 = vmatpush1.bf16.msra.mxu1 %v3216_v11 }
  0xfe   :  { %1948 = vmatprep.subr.bf16.mxu0 %v3221_v12  ;;  %2054 = vmatprep.subr.bf16.mxu1 %v3224_v13 }
 0x101   :  { %1949 = vmatpush1.bf16.msra.mxu0 %v3219_v14  ;;  %2055 = vmatpush1.bf16.msra.mxu1 %v3222_v15 }
 0x102   :  { %1950 = vmatprep.subr.bf16.mxu0 %v3227_v16  ;;  %2056 = vmatprep.subr.bf16.mxu1 %v3230_v17  ;;  %v3243_v17 = vld [vmem:[#allocation6 + $0x220] ss:$16 sps:$4 sm:$0xff]  }
 0x105   :  { %1951 = vmatpush1.bf16.msra.mxu0 %v3225_v18  ;;  %2057 = vmatpush1.bf16.msra.mxu1 %v3228_v19 }
 0x106   :  { %1952 = vmatprep.subr.bf16.mxu0 %v3233_v20  ;;  %2058 = vmatprep.subr.bf16.mxu1 %v3236_v21 }
 0x109   :  { %1953 = vmatpush1.bf16.msra.mxu0 %v3231_v22  ;;  %2059 = vmatpush1.bf16.msra.mxu1 %v3234_v23  ;;  %v3246_v22 = vld [vmem:[#allocation6 + $0x228] ss:$16 sps:$4 sm:$0xff]   ;;  %v3251_v23 = vld [vmem:[#allocation6 + $0x244] ss:$16 sps:$4 sm:$0xff]  }
 0x10a   :  { %1975 = vmatprep.subr.bf16.mxu0 %v3239_v24  ;;  %2081 = vmatprep.subr.bf16.mxu1 %v3242_v25 }
 0x19e   :  { %v983_v37 = vpop.f32.mrb[0].mxu0  ;;  %v1089_v38 = vpop.f32.mrb[0].mxu1 }
 0x19f   :  { %v2875_v39 = vadd.f32 %v983_v37, %v239_v33  ;;  %v2883_v40 = vadd.f32 %v1089_v38, %v247_v34  ;;  %v985_v41 = vpop.f32.mrb[1].mxu0  ;;  %v1091_v42 = vpop.f32.mrb[1].mxu1  ;;  %v3254_v37 = vld [vmem:[#allocation6 + $0x24c] ss:$16 sps:$4 sm:$0xff]  }
 0x1a0   :  { %v2876_v43 = vadd.f32 %v985_v41, %v243_v35  ;;  %v2884_v44 = vadd.f32 %v1091_v42, %v251_v36  ;;  %v987_v45 = vpop.f32.mrb[2].mxu0  ;;  %v1093_v46 = vpop.f32.mrb[2].mxu1 }
 0x1a1   :  { %v2877_v47 = vadd.f32 %v987_v45, %v239_v33  ;;  %v2885_v48 = vadd.f32 %v1093_v46, %v247_v34  ;;  %v989_v49 = vpop.f32.mrb[3].mxu0  ;;  %v1095_v50 = vpop.f32.mrb[3].mxu1  ;;  %v1108_v53 = vmax.f32 %v2875_v39, 0.0  ;;  %v1110_v54 = vmax.f32 %v2883_v40, 0.0  ;;  %v3260_v45 = vld [vmem:[#allocation6 + $0x26c] ss:$16 sps:$4 sm:$0xff]  }
 0x1a2   :  { %v2878_v51 = vadd.f32 %v989_v49, %v243_v35  ;;  %v2886_v52 = vadd.f32 %v1095_v50, %v251_v36  ;;  %v1109_v57 = vmax.f32 %v2876_v43, 0.0  ;;  %v1111_v58 = vmax.f32 %v2884_v44, 0.0  ;;  %v3252_v43 = vld [vmem:[#allocation6 + $0x248] ss:$16 sps:$4 sm:$0xff]   ;;  %v3255_v46 = vld [vmem:[#allocation6 + $0x260] ss:$16 sps:$4 sm:$0xff]  }
 0x1a3   :  { %v1112_v55 = vmax.f32 %v2877_v47, 0.0  ;;  %v1114_v56 = vmax.f32 %v2885_v48, 0.0  ;;  %v3258_v47 = vld [vmem:[#allocation6 + $0x268] ss:$16 sps:$4 sm:$0xff]   ;;  %v3263_v48 = vld [vmem:[#allocation6 + $0x284] ss:$16 sps:$4 sm:$0xff]  }
 0x1a4   :  { %v1113_v59 = vmax.f32 %v2878_v51, 0.0  ;;  %v1115_v60 = vmax.f32 %v2886_v52, 0.0  ;;  %v3266_v49 = vld [vmem:[#allocation6 + $0x28c] ss:$16 sps:$4 sm:$0xff]   ;;  %v3261_v50 = vld [vmem:[#allocation6 + $0x280] ss:$16 sps:$4 sm:$0xff]  }
 0x1a5   :  { %v1124_v61 = vpack.c.bf16 %v1112_v55, %v1108_v53  ;;  %v3587_v62 = vpack.c.bf16 %v1114_v56, %v1110_v54  ;;  %v3264_v51 = vld [vmem:[#allocation6 + $0x288] ss:$16 sps:$4 sm:$0xff]   ;;  %v3269_v52 = vld [vmem:[#allocation6 + $0x2a4] ss:$16 sps:$4 sm:$0xff]   ;;  %v3272_v53 = vld [vmem:[#allocation6 + $0x2ac] ss:$16 sps:$4 sm:$0xff]  }
 0x1a6   :  { %v1125_v63 = vpack.c.bf16 %v1113_v59, %v1109_v57  ;;  %v1127_v0 = vpack.c.bf16 %v1115_v60, %v1111_v58  ;;  %v993_v1 = vpop.f32.mrb[4].mxu0  ;;  %v1099_v4 = vpop.f32.mrb[4].mxu1  ;;  %v3267_v54 = vld [vmem:[#allocation6 + $0x2a0] ss:$16 sps:$4 sm:$0xff]   ;;  %v3270_v55 = vld [vmem:[#allocation6 + $0x2a8] ss:$16 sps:$4 sm:$0xff]  }
 0x1a7   :  { %v2879_v5 = vadd.f32 %v993_v1, %v239_v33  ;;  %v995_v6 = vpop.f32.mrb[5].mxu0  ;;  %v2887_v9 = vadd.f32 %v1099_v4, %v247_v34  ;;  %v1101_v10 = vpop.f32.mrb[5].mxu1  ;;  %v3275_v56 = vld [vmem:[#allocation6 + $0x2c4] ss:$16 sps:$4 sm:$0xff]   ;;  %v3278_v57 = vld [vmem:[#allocation6 + $0x2cc] ss:$16 sps:$4 sm:$0xff]  }
 0x1a8   :  { %v2880_v11 = vadd.f32 %v995_v6, %v243_v35  ;;  %v997_v12 = vpop.f32.mrb[6].mxu0  ;;  %1954 = vmatprep.mubr.bf16.mxu0 %v1125_v63  ;;  %2060 = vmatprep.mubr.bf16.mxu1 %v1125_v63  ;;  %v2888_v13 = vadd.f32 %v1101_v10, %v251_v36  ;;  %v1103_v14 = vpop.f32.mrb[6].mxu1  ;;  %v3273_v58 = vld [vmem:[#allocation6 + $0x2c0] ss:$16 sps:$4 sm:$0xff]   ;;  %v3276_v59 = vld [vmem:[#allocation6 + $0x2c8] ss:$16 sps:$4 sm:$0xff]  }
 0x1a9   :  { %v2881_v15 = vadd.f32 %v997_v12, %v239_v33  ;;  %v999_v16 = vpop.f32.mrb[7].mxu0  ;;  %1955 = vmatmul.mubr.bf16.vlgmr.msra.gmra.mrb[8].mxu0 %v1124_v61  ;;  %2061 = vmatmul.mubr.bf16.vlgmr.msra.gmra.mrb[8].mxu1 %v1124_v61  ;;  %v1118_v18 = vmax.f32 %v2887_v9, 0.0  ;;  %v2889_v19 = vadd.f32 %v1103_v14, %v247_v34  ;;  %v1105_v20 = vpop.f32.mrb[7].mxu1  ;;  %v1116_v26 = vmax.f32 %v2879_v5, 0.0  ;;  %v3281_v60 = vld [vmem:[#allocation6 + $0x2e4] ss:$16 sps:$4 sm:$0xff]  }
 0x1aa   :  { %v2882_v21 = vadd.f32 %v999_v16, %v243_v35  ;;  %1976 = vmatpush1.bf16.msra.mxu0 %v3237_v2  ;;  %2082 = vmatpush1.bf16.msra.mxu1 %v3240_v3  ;;  %v1119_v24 = vmax.f32 %v2888_v13, 0.0  ;;  %v2890_v25 = vadd.f32 %v1105_v20, %v251_v36  ;;  %v1117_v38 = vmax.f32 %v2880_v11, 0.0  ;;  %v3249_v35 = vld [vmem:[#allocation6 + $0x240] ss:$16 sps:$4 sm:$0xff]   ;;  %v3257_v36 = vld [vmem:[#allocation6 + $0x264] ss:$16 sps:$4 sm:$0xff]  }
 0x1ab   :  { %v1120_v30 = vmax.f32 %v2881_v15, 0.0  ;;  %1977 = vmatprep.subr.bf16.mxu0 %v3245_v7  ;;  %2083 = vmatprep.subr.bf16.mxu1 %v3248_v8  ;;  %v1122_v33 = vmax.f32 %v2889_v19, 0.0  ;;  %v3284_v61 = vld [vmem:[#allocation6 + $0x2ec] ss:$16 sps:$4 sm:$0xff]   ;;  %v3279_v63 = vld [vmem:[#allocation6 + $0x2e0] ss:$16 sps:$4 sm:$0xff]  }
 0x1ac   :  { %v1121_v39 = vmax.f32 %v2882_v21, 0.0  ;;  %v1123_v40 = vmax.f32 %v2890_v25, 0.0  ;;  %v3287_v1 = vld [vmem:[#allocation6 + $0x304] ss:$16 sps:$4 sm:$0xff]   ;;  %v3290_v2 = vld [vmem:[#allocation6 + $0x30c] ss:$16 sps:$4 sm:$0xff]  }
 0x1ad   :  { %v1128_v41 = vpack.c.bf16 %v1120_v30, %v1116_v26  ;;  %v3589_v42 = vpack.c.bf16 %v1122_v33, %v1118_v18  ;;  %v3285_v3 = vld [vmem:[#allocation6 + $0x300] ss:$16 sps:$4 sm:$0xff]   ;;  %v3288_v4 = vld [vmem:[#allocation6 + $0x308] ss:$16 sps:$4 sm:$0xff]   ;;  %v3293_v5 = vld [vmem:[#allocation6 + $0x324] ss:$16 sps:$4 sm:$0xff]  }
 0x1ae   :  { %v1129_v34 = vpack.c.bf16 %v1121_v39, %v1117_v38  ;;  %1978 = vmatpush1.bf16.msra.mxu0 %v3243_v17  ;;  %2084 = vmatpush1.bf16.msra.mxu1 %v3246_v22  ;;  %v3591_v44 = vpack.c.bf16 %v1123_v40, %v1119_v24  ;;  %v3296_v6 = vld [vmem:[#allocation6 + $0x32c] ss:$16 sps:$4 sm:$0xff]   ;;  %v3291_v7 = vld [vmem:[#allocation6 + $0x320] ss:$16 sps:$4 sm:$0xff]   ;;  %v3294_v8 = vld [vmem:[#allocation6 + $0x328] ss:$16 sps:$4 sm:$0xff]  }
 0x1af   :  { %1979 = vmatprep.subr.bf16.mxu0 %v3251_v23  ;;  %2085 = vmatprep.subr.bf16.mxu1 %v3254_v37  ;;  %v3299_v9 = vld [vmem:[#allocation6 + $0x344] ss:$16 sps:$4 sm:$0xff]   ;;  %v3302_v10 = vld [vmem:[#allocation6 + $0x34c] ss:$16 sps:$4 sm:$0xff]   ;;  %v3297_v11 = vld [vmem:[#allocation6 + $0x340] ss:$16 sps:$4 sm:$0xff]  }
 0x1b0   :  { %1964 = vmatprep.mubr.bf16.mxu0 %v1129_v34  ;;  %2070 = vmatprep.mubr.bf16.mxu1 %v1129_v34  ;;  %v3300_v12 = vld [vmem:[#allocation6 + $0x348] ss:$16 sps:$4 sm:$0xff]   ;;  %v3305_v13 = vld [vmem:[#allocation6 + $0x364] ss:$16 sps:$4 sm:$0xff]   ;;  %v3308_v14 = vld [vmem:[#allocation6 + $0x36c] ss:$16 sps:$4 sm:$0xff]  }
 0x1b1   :  { %1965 = vmatmul.mubr.bf16.gmra.mrb[12].mxu0 %v1128_v41  ;;  %2071 = vmatmul.mubr.bf16.gmra.mrb[12].mxu1 %v1128_v41  ;;  %v3303_v15 = vld [vmem:[#allocation6 + $0x360] ss:$16 sps:$4 sm:$0xff]   ;;  %v3306_v16 = vld [vmem:[#allocation6 + $0x368] ss:$16 sps:$4 sm:$0xff]   ;;  %v3311_v17 = vld [vmem:[#allocation6 + $0x384] ss:$16 sps:$4 sm:$0xff]  }
 0x1b2   :  { %1980 = vmatpush1.bf16.msra.mxu0 %v3249_v35  ;;  %2086 = vmatpush1.bf16.msra.mxu1 %v3252_v43  ;;  %v3314_v18 = vld [vmem:[#allocation6 + $0x38c] ss:$16 sps:$4 sm:$0xff]   ;;  %v3309_v19 = vld [vmem:[#allocation6 + $0x380] ss:$16 sps:$4 sm:$0xff]   ;;  %v3312_v20 = vld [vmem:[#allocation6 + $0x388] ss:$16 sps:$4 sm:$0xff]  }
 0x1b3   :  { %2007 = vmatprep.mubr.bf16.mxu0 %v1127_v0  ;;  %2113 = vmatprep.mubr.bf16.mxu1 %v1127_v0  ;;  %v3282_v0 = vld [vmem:[#allocation6 + $0x2e8] ss:$16 sps:$4 sm:$0xff]   ;;  %v3317_v21 = vld [vmem:[#allocation6 + $0x3a4] ss:$16 sps:$4 sm:$0xff]   ;;  %v3320_v22 = vld [vmem:[#allocation6 + $0x3ac] ss:$16 sps:$4 sm:$0xff]  }
 0x1b4   :  { %1981 = vmatprep.subr.bf16.mxu0 %v3257_v36  ;;  %2087 = vmatprep.subr.bf16.mxu1 %v3260_v45  ;;  %v3315_v23 = vld [vmem:[#allocation6 + $0x3a0] ss:$16 sps:$4 sm:$0xff]   ;;  %v3318_v24 = vld [vmem:[#allocation6 + $0x3a8] ss:$16 sps:$4 sm:$0xff]   ;;  %v3323_v25 = vld [vmem:[#allocation6 + $0x3c4] ss:$16 sps:$4 sm:$0xff]  }
 0x1b5   :  { %v3326_v26 = vld [vmem:[#allocation6 + $0x3cc] ss:$16 sps:$4 sm:$0xff]   ;;  %v3321_v30 = vld [vmem:[#allocation6 + $0x3c0] ss:$16 sps:$4 sm:$0xff]   ;;  %v3324_v37 = vld [vmem:[#allocation6 + $0x3c8] ss:$16 sps:$4 sm:$0xff]  }
 0x1b6   :  { %1982 = vmatpush1.bf16.msra.mxu0 %v3255_v46  ;;  %2088 = vmatpush1.bf16.msra.mxu1 %v3258_v47  ;;  %v3329_v33 = vld [vmem:[#allocation6 + $0x3e4] ss:$16 sps:$4 sm:$0xff]   ;;  %v3332_v38 = vld [vmem:[#allocation6 + $0x3ec] ss:$16 sps:$4 sm:$0xff]   ;;  %v3327_v39 = vld [vmem:[#allocation6 + $0x3e0] ss:$16 sps:$4 sm:$0xff]  }
 0x1b7   :  { %1983 = vmatprep.subr.bf16.mxu0 %v3263_v48  ;;  %2089 = vmatprep.subr.bf16.mxu1 %v3266_v49  ;;  %v3330_v40 = vld [vmem:[#allocation6 + $0x3e8] ss:$16 sps:$4 sm:$0xff]   ;;  %v3333_v41 = vld [vmem:[#allocation7 + $0x40] sm:$0xff]   ;;  %v3341_v48 = vld [vmem:[#allocation7 + $0x50] sm:$0xff]  }
 0x1b8   :  { %v3334_v34 = vld [vmem:[#allocation7 + $0xc0] sm:$0xff]   ;;  %v3337_v36 = vld [vmem:[#allocation7 + $0x48] sm:$0xff]   ;;  %v3342_v49 = vld [vmem:[#allocation7 + $0xd0] sm:$0xff]  }
 0x1b9   :  { %v3335_v35 = vld [vmem:[#allocation7] sm:$0xff]   ;;  %v3338_v45 = vld [vmem:[#allocation7 + $0xc8] sm:$0xff]  }
 0x1ba   :  { %1984 = vmatpush1.bf16.msra.mxu0 %v3261_v50  ;;  %2090 = vmatpush1.bf16.msra.mxu1 %v3264_v51  ;;  %v3336_v43 = vld [vmem:[#allocation7 + $0x80] sm:$0xff]   ;;  %v3339_v46 = vld [vmem:[#allocation7 + $0x8] sm:$0xff]   ;;  %v3343_v50 = vld [vmem:[#allocation7 + $0x10] sm:$0xff]  }
 0x1bb   :  { %1985 = vmatprep.subr.bf16.mxu0 %v3269_v52  ;;  %2091 = vmatprep.subr.bf16.mxu1 %v3272_v53  ;;  %v3340_v47 = vld [vmem:[#allocation7 + $0x88] sm:$0xff]   ;;  %v3344_v51 = vld [vmem:[#allocation7 + $0x90] sm:$0xff]   ;;  %v3345_v52 = vld [vmem:[#allocation7 + $0x58] sm:$0xff]  }
 0x1bc   :  { %v3348_v53 = vld [vmem:[#allocation7 + $0x98] sm:$0xff]  }
 0x1be   :  { %1986 = vmatpush1.bf16.msra.mxu0 %v3267_v54  ;;  %2092 = vmatpush1.bf16.msra.mxu1 %v3270_v55  ;;  %v3349_v54 = vld [vmem:[#allocation7 + $0x60] sm:$0xff]  }
 0x1bf   :  { %1987 = vmatprep.subr.bf16.mxu0 %v3275_v56  ;;  %2093 = vmatprep.subr.bf16.mxu1 %v3278_v57  ;;  %v3350_v55 = vld [vmem:[#allocation7 + $0xe0] sm:$0xff]  }
 0x1c0   :  { %v3351_v56 = vld [vmem:[#allocation7 + $0x20] sm:$0xff]  }
 0x1c1   :  { %v3352_v57 = vld [vmem:[#allocation7 + $0xa0] sm:$0xff]  }
 0x1c2   :  { %1988 = vmatpush1.bf16.msra.mxu0 %v3273_v58  ;;  %2094 = vmatpush1.bf16.msra.mxu1 %v3276_v59  ;;  %v3353_v58 = vld [vmem:[#allocation7 + $0x68] sm:$0xff]  }
 0x1c3   :  { %1989 = vmatprep.subr.bf16.mxu0 %v3281_v60  ;;  %2095 = vmatprep.subr.bf16.mxu1 %v3284_v61  ;;  %v3354_v59 = vld [vmem:[#allocation7 + $0xe8] sm:$0xff]   ;;  %v3357_v61 = vld [vmem:[#allocation7 + $0x70] sm:$0xff]  }
 0x1c4   :  { %v3356_v60 = vld [vmem:[#allocation7 + $0xa8] sm:$0xff]  }
 0x1c6   :  { %1990 = vmatpush1.bf16.msra.mxu0 %v3279_v63  ;;  %2096 = vmatpush1.bf16.msra.mxu1 %v3282_v0  ;;  %v3358_v63 = vld [vmem:[#allocation7 + $0xf0] sm:$0xff]  }
 0x1c7   :  { %1991 = vmatprep.subr.bf16.mxu0 %v3287_v1  ;;  %2097 = vmatprep.subr.bf16.mxu1 %v3290_v2  ;;  %v3359_v0 = vld [vmem:[#allocation7 + $0x30] sm:$0xff]   ;;  %v3361_v2 = vld [vmem:[#allocation7 + $0x78] sm:$0xff]  }
 0x1c8   :  { %v3360_v1 = vld [vmem:[#allocation7 + $0xb0] sm:$0xff]  }
 0x1ca   :  { %1992 = vmatpush1.bf16.msra.mxu0 %v3285_v3  ;;  %2098 = vmatpush1.bf16.msra.mxu1 %v3288_v4  ;;  %v3362_v3 = vld [vmem:[#allocation7 + $0xf8] sm:$0xff]  }
 0x1cb   :  { %1993 = vmatprep.subr.bf16.mxu0 %v3293_v5  ;;  %2099 = vmatprep.subr.bf16.mxu1 %v3296_v6  ;;  %v3363_v4 = vld [vmem:[#allocation7 + $0x38] sm:$0xff]   ;;  %v1260_v6 = vld [vmem:[%s3629_s4] sm:$0xf] }
 0x1cc   :  { %v3364_v5 = vld [vmem:[#allocation7 + $0xb8] sm:$0xff]  }
 0x1ce   :  { %1994 = vmatpush1.bf16.msra.mxu0 %v3291_v7  ;;  %2100 = vmatpush1.bf16.msra.mxu1 %v3294_v8  ;;  %v1265_v7 = vrot.slane %v1260_v6, %v238_v28  ;;  %v1273_v8 = vrot.slane %v1260_v6, %v246_v29 }
 0x1cf   :  { %1995 = vmatprep.subr.bf16.mxu0 %v3299_v9  ;;  %2101 = vmatprep.subr.bf16.mxu1 %v3302_v10  ;;  %v1269_v9 = vrot.slane %v1260_v6, %v242_v31  ;;  %v1277_v10 = vrot.slane %v1260_v6, %v250_v32 }
 0x1d2   :  { %1996 = vmatpush1.bf16.msra.mxu0 %v3297_v11  ;;  %2102 = vmatpush1.bf16.msra.mxu1 %v3300_v12 }
 0x1d3   :  { %1997 = vmatprep.subr.bf16.mxu0 %v3305_v13  ;;  %2103 = vmatprep.subr.bf16.mxu1 %v3308_v14 }
 0x1d6   :  { %1998 = vmatpush1.bf16.msra.mxu0 %v3303_v15  ;;  %2104 = vmatpush1.bf16.msra.mxu1 %v3306_v16 }
 0x1d7   :  { %1999 = vmatprep.subr.bf16.mxu0 %v3311_v17  ;;  %2105 = vmatprep.subr.bf16.mxu1 %v3314_v18 }
 0x1da   :  { %2000 = vmatpush1.bf16.msra.mxu0 %v3309_v19  ;;  %2106 = vmatpush1.bf16.msra.mxu1 %v3312_v20 }
 0x1db   :  { %2001 = vmatprep.subr.bf16.mxu0 %v3317_v21  ;;  %2107 = vmatprep.subr.bf16.mxu1 %v3320_v22 }
 0x1de   :  { %2002 = vmatpush1.bf16.msra.mxu0 %v3315_v23  ;;  %2108 = vmatpush1.bf16.msra.mxu1 %v3318_v24 }
 0x1df   :  { %2003 = vmatprep.subr.bf16.mxu0 %v3323_v25  ;;  %2109 = vmatprep.subr.bf16.mxu1 %v3326_v26 }
 0x1e2   :  { %2004 = vmatpush1.bf16.msra.mxu0 %v3321_v30  ;;  %2110 = vmatpush1.bf16.msra.mxu1 %v3324_v37 }
 0x1e3   :  { %2005 = vmatprep.subr.bf16.mxu0 %v3329_v33  ;;  %2111 = vmatprep.subr.bf16.mxu1 %v3332_v38 }
 0x1e6   :  { %2006 = vmatpush1.bf16.msra.mxu0 %v3327_v39  ;;  %2112 = vmatpush1.bf16.msra.mxu1 %v3330_v40 }
 0x1e7   :  { %2819 = vmatprep.subr.bf16.mxu0 %v3333_v41  ;;  %2847 = vmatprep.subr.bf16.mxu1 %v3334_v34 }
 0x1e9   :  { %2008 = vmatmul.mubr.bf16.vlgmr.msra.gmra.mrb[8].mxu0 %v3587_v62  ;;  %2114 = vmatmul.mubr.bf16.vlgmr.msra.gmra.mrb[8].mxu1 %v3587_v62  ;;  %v3346_v62 = vld [vmem:[#allocation7 + $0xd8] sm:$0xff]  }
 0x1ea   :  { %2017 = vmatprep.mubr.bf16.mxu0 %v3591_v44  ;;  %2123 = vmatprep.mubr.bf16.mxu1 %v3591_v44  ;;  %v3347_v44 = vld [vmem:[#allocation7 + $0x18] sm:$0xff]  }
 0x1eb   :  { %2820 = vmatpush3.bf16.msra.mxu0 %v3335_v35  ;;  %2848 = vmatpush3.bf16.msra.mxu1 %v3336_v43 }
 0x1ec   :  { %2821 = vmatprep.subr.bf16.mxu0 %v3337_v36  ;;  %2849 = vmatprep.subr.bf16.mxu1 %v3338_v45 }
 0x1ef   :  { %2822 = vmatpush3.bf16.msra.mxu0 %v3339_v46  ;;  %2850 = vmatpush3.bf16.msra.mxu1 %v3340_v47 }
 0x1f0   :  { %2823 = vmatprep.subr.bf16.mxu0 %v3341_v48  ;;  %2851 = vmatprep.subr.bf16.mxu1 %v3342_v49 }
 0x1f1   :  { %2018 = vmatmul.mubr.bf16.gmra.mrb[12].mxu0 %v3589_v42  ;;  %2124 = vmatmul.mubr.bf16.gmra.mrb[12].mxu1 %v3589_v42  ;;  %v3355_v42 = vld [vmem:[#allocation7 + $0x28] sm:$0xff]  }
 0x1f3   :  { %2824 = vmatpush3.bf16.msra.mxu0 %v3343_v50  ;;  %2852 = vmatpush3.bf16.msra.mxu1 %v3344_v51 }
 0x1f4   :  { %2825 = vmatprep.subr.bf16.mxu0 %v3345_v52  ;;  %2853 = vmatprep.subr.bf16.mxu1 %v3346_v62 }
 0x1f7   :  { %2826 = vmatpush3.bf16.msra.mxu0 %v3347_v44  ;;  %2854 = vmatpush3.bf16.msra.mxu1 %v3348_v53 }
 0x1f8   :  { %2827 = vmatprep.subr.bf16.mxu0 %v3349_v54  ;;  %2855 = vmatprep.subr.bf16.mxu1 %v3350_v55 }
 0x1fb   :  { %2828 = vmatpush3.bf16.msra.mxu0 %v3351_v56  ;;  %2856 = vmatpush3.bf16.msra.mxu1 %v3352_v57 }
 0x1fc   :  { %2829 = vmatprep.subr.bf16.mxu0 %v3353_v58  ;;  %2857 = vmatprep.subr.bf16.mxu1 %v3354_v59 }
 0x1ff   :  { %2830 = vmatpush3.bf16.msra.mxu0 %v3355_v42  ;;  %2858 = vmatpush3.bf16.msra.mxu1 %v3356_v60 }
 0x200   :  { %2831 = vmatprep.subr.bf16.mxu0 %v3357_v61  ;;  %2859 = vmatprep.subr.bf16.mxu1 %v3358_v63 }
 0x203   :  { %2832 = vmatpush3.bf16.msra.mxu0 %v3359_v0  ;;  %2860 = vmatpush3.bf16.msra.mxu1 %v3360_v1 }
 0x204   :  { %2833 = vmatprep.subr.bf16.mxu0 %v3361_v2  ;;  %2861 = vmatprep.subr.bf16.mxu1 %v3362_v3 }
 0x207   :  { %2834 = vmatpush3.bf16.msra.mxu0 %v3363_v4  ;;  %2862 = vmatpush3.bf16.msra.mxu1 %v3364_v5  ;;  %v2786_v5 = vld [vmem:[%s3631_s6] ss:$0 sm:$0xff] }
 0x2bc   :  { %v2009_v11 = vpop.f32.mrb[8].mxu0  ;;  %v2115_v12 = vpop.f32.mrb[8].mxu1 }
 0x2bd   :  { %v2891_v13 = vadd.f32 %v2009_v11, %v1265_v7  ;;  %v2899_v14 = vadd.f32 %v2115_v12, %v1273_v8  ;;  %v2011_v15 = vpop.f32.mrb[9].mxu0  ;;  %v2117_v16 = vpop.f32.mrb[9].mxu1 }
 0x2be   :  { %v2892_v17 = vadd.f32 %v2011_v15, %v1269_v9  ;;  %v2900_v18 = vadd.f32 %v2117_v16, %v1277_v10  ;;  %v2013_v19 = vpop.f32.mrb[10].mxu0  ;;  %v2119_v20 = vpop.f32.mrb[10].mxu1 }
 0x2bf   :  { %v2893_v28 = vadd.f32 %v2013_v19, %v1265_v7  ;;  %v2901_v21 = vadd.f32 %v2119_v20, %v1273_v8  ;;  %v2015_v22 = vpop.f32.mrb[11].mxu0  ;;  %v2121_v29 = vpop.f32.mrb[11].mxu1  ;;  %v2134_v31 = vmax.f32 %v2891_v13, 0.0  ;;  %v2136_v25 = vmax.f32 %v2899_v14, 0.0 }
 0x2c0   :  { %v2894_v23 = vadd.f32 %v2015_v22, %v1269_v9  ;;  %v2902_v24 = vadd.f32 %v2121_v29, %v1277_v10  ;;  %v2135_v26 = vmax.f32 %v2892_v17, 0.0  ;;  %v2137_v30 = vmax.f32 %v2900_v18, 0.0 }
 0x2c1   :  { %v2138_v27 = vmax.f32 %v2893_v28, 0.0  ;;  %v2140_v32 = vmax.f32 %v2901_v21, 0.0 }
 0x2c2   :  { %v2139_v37 = vmax.f32 %v2894_v23, 0.0  ;;  %v2141_v33 = vmax.f32 %v2902_v24, 0.0 }
 0x2c3   :  { %v2150_v38 = vpack.c.bf16 %v2138_v27, %v2134_v31  ;;  %v2152_v39 = vpack.c.bf16 %v2140_v32, %v2136_v25 }
 0x2c4   :  { %v2151_v40 = vpack.c.bf16 %v2139_v37, %v2135_v26  ;;  %v2153_v41 = vpack.c.bf16 %v2141_v33, %v2137_v30  ;;  %v2019_v34 = vpop.f32.mrb[12].mxu0  ;;  %v2125_v35 = vpop.f32.mrb[12].mxu1 }
 0x2c5   :  { %v2895_v43 = vadd.f32 %v2019_v34, %v1265_v7  ;;  %v2903_v36 = vadd.f32 %v2125_v35, %v1273_v8  ;;  %v2021_v45 = vpop.f32.mrb[13].mxu0  ;;  %v2127_v46 = vpop.f32.mrb[13].mxu1 }
 0x2c6   :  { %v2896_v47 = vadd.f32 %v2021_v45, %v1269_v9  ;;  %v2904_v48 = vadd.f32 %v2127_v46, %v1277_v10  ;;  %v2023_v49 = vpop.f32.mrb[14].mxu0  ;;  %v2129_v50 = vpop.f32.mrb[14].mxu1  ;;  %2453 = vmatprep.mubr.bf16.mxu0 %v2151_v40  ;;  %2502 = vmatprep.mubr.bf16.mxu1 %v2153_v41 }
 0x2c7   :  { %v2897_v51 = vadd.f32 %v2023_v49, %v1265_v7  ;;  %v2905_v52 = vadd.f32 %v2129_v50, %v1273_v8  ;;  %v2025_v62 = vpop.f32.mrb[15].mxu0  ;;  %v2131_v44 = vpop.f32.mrb[15].mxu1  ;;  %2454 = vmatmul.mubr.bf16.vlgmr.msra.gmra.mrb[16].mxu0 %v2150_v38  ;;  %2503 = vmatmul.mubr.bf16.vlgmr.msra.gmra.mrb[16].mxu1 %v2152_v39  ;;  %v2142_v55 = vmax.f32 %v2895_v43, 0.0  ;;  %v2144_v56 = vmax.f32 %v2903_v36, 0.0 }
 0x2c8   :  { %v2898_v53 = vadd.f32 %v2025_v62, %v1269_v9  ;;  %v2906_v54 = vadd.f32 %v2131_v44, %v1277_v10  ;;  %v2143_v59 = vmax.f32 %v2896_v47, 0.0  ;;  %v2145_v42 = vmax.f32 %v2904_v48, 0.0 }
 0x2c9   :  { %v2146_v57 = vmax.f32 %v2897_v51, 0.0  ;;  %v2148_v58 = vmax.f32 %v2905_v52, 0.0 }
 0x2ca   :  { %v2147_v60 = vmax.f32 %v2898_v53, 0.0  ;;  %v2149_v61 = vmax.f32 %v2906_v54, 0.0 }
 0x2cb   :  { %v2154_v63 = vpack.c.bf16 %v2146_v57, %v2142_v55  ;;  %v2156_v0 = vpack.c.bf16 %v2148_v58, %v2144_v56 }
 0x2cc   :  { %v2155_v1 = vpack.c.bf16 %v2147_v60, %v2143_v59  ;;  %v2157_v2 = vpack.c.bf16 %v2149_v61, %v2145_v42 }
 0x2ce   :  { %2461 = vmatprep.mubr.bf16.mxu0 %v2155_v1  ;;  %2510 = vmatprep.mubr.bf16.mxu1 %v2157_v2 }
 0x2cf   :  { %2462 = vmatmul.mubr.bf16.gmra.mrb[20].mxu0 %v2154_v63  ;;  %2511 = vmatmul.mubr.bf16.gmra.mrb[20].mxu1 %v2156_v0 }
 0x39a   :  { %v2835_v3 = vpop.f32.mrb[16].mxu0  ;;  %v2863_v4 = vpop.f32.mrb[16].mxu1 }
 0x39b   :  { %v2836_v6 = vpop.f32.mrb[17].mxu0  ;;  %v2864_v7 = vpop.f32.mrb[17].mxu1 }
 0x39c   :  { %v2837_v8 = vadd.f32 %v2836_v6, %v2835_v3  ;;  %v2865_v9 = vadd.f32 %v2864_v7, %v2863_v4  ;;  %v2838_v10 = vpop.f32.mrb[18].mxu0  ;;  %v2866_v11 = vpop.f32.mrb[18].mxu1 }
 0x39d   :  { %v2839_v12 = vpop.f32.mrb[19].mxu0  ;;  %v2867_v13 = vpop.f32.mrb[19].mxu1 }
 0x39e   :  { %v2456_v14 = vadd.f32 %v2837_v8, %v2786_v5  ;;  %v2840_v15 = vadd.f32 %v2839_v12, %v2838_v10  ;;  %v2868_v16 = vadd.f32 %v2867_v13, %v2866_v11 }
 0x3a0   :  { %v2505_v17 = vadd.f32 %v2865_v9, %v2456_v14  ;;  %v2459_v18 = vadd.f32 %v2840_v15, %v2786_v5 }
 0x3a2   :  { %2519 = vst [vmem:[%s3632_s7] sm:$0xff] %v2505_v17  ;;  %v2508_v19 = vadd.f32 %v2868_v16, %v2459_v18  ;;  %v2841_v20 = vpop.f32.mrb[20].mxu0  ;;  %v2869_v28 = vpop.f32.mrb[20].mxu1 }
 0x3a3   :  { %v2842_v21 = vpop.f32.mrb[21].mxu0  ;;  %v2870_v22 = vpop.f32.mrb[21].mxu1 }
 0x3a4   :  { %2520 = vst [vmem:[%s3632_s7 + $0x8] sm:$0xff] %v2508_v19  ;;  %v2843_v29 = vadd.f32 %v2842_v21, %v2841_v20  ;;  %v2871_v23 = vadd.f32 %v2870_v22, %v2869_v28  ;;  %v2844_v24 = vpop.f32.mrb[22].mxu0  ;;  %v2872_v31 = vpop.f32.mrb[22].mxu1 }
 0x3a5   :  { %v2845_v25 = vpop.f32.mrb[23].mxu0  ;;  %v2873_v27 = vpop.f32.mrb[23].mxu1 }
 0x3a6   :  { %v2464_v32 = vadd.f32 %v2843_v29, %v2786_v5  ;;  %v2846_v26 = vadd.f32 %v2845_v25, %v2844_v24  ;;  %v2874_v30 = vadd.f32 %v2873_v27, %v2872_v31 }
 0x3a8   :  { %v2513_v37 = vadd.f32 %v2871_v23, %v2464_v32  ;;  %v2467_v33 = vadd.f32 %v2846_v26, %v2786_v5 }
 0x3aa   :  { %2521 = vst [vmem:[%s3632_s7 + $0x10] sm:$0xff] %v2513_v37  ;;  %v2516_v38 = vadd.f32 %v2874_v30, %v2467_v33 }
 0x3ac   :  { %2522 = vst [vmem:[%s3632_s7 + $0x18] sm:$0xff] %v2516_v38 }
 0x3ad   :  { %2527 = vsyncpa [#allocation3], 1 }
 0x3ae   :  { %2528 = vsyncpa [#allocation5], 1 }
 0x3af   :  { %2529 = vsyncpa [#allocation8], 1 }

</bundles_post_ra>
